<compile_context>
chip_gen: v7x
topology: tpu7x:2x2x1
jax: 0.10.0
libtpu: 0.0.40
codegen_flags: <defaults>
</compile_context>

<pallas_src>
import functools

import jax
import jax.numpy as jnp
from jax.experimental import pallas as pl
from jax.experimental.pallas import tpu as pltpu


def _ceil_to(v, m):
    return (v + m - 1) // m * m


def _vmem_capacity_bytes():
    """Physical VMEM per core (128 MiB v5e/v6e, 64 MiB v7x), with a safe
    fallback if the query is unavailable in this environment."""
    try:
        info = pltpu.get_tpu_info()
        cap = int(getattr(info, "vmem_capacity_bytes", 0))
        if cap > 0:
            return cap
    except Exception:
        pass
    return 64 * 1024 * 1024          # conservative (v7x-sized) fallback


def _pad2(a, rows, cols):
    a = a.astype(jnp.float32)
    return jnp.pad(a, ((0, rows - a.shape[0]), (0, cols - a.shape[1])))


def _build_step_tables(params, k, n_gcn, d_pad):
    """Per-step W stack (identity for SGConv hops, padded Wg_l for GCN layers)
    and per-step bias table (zeros / bsg / bg_l), zero-padded to d_pad lanes."""
    ws = [jnp.eye(d_pad, dtype=jnp.float32)]
    for l in range(n_gcn):
        ws.append(_pad2(params[f"wg{l}"], d_pad, d_pad))
    w_stack = jnp.stack(ws, axis=0)                       # [1 + n_gcn, Dp, Dp]

    rows = []
    for s in range(k + n_gcn):
        if s < k - 1:
            rows.append(jnp.zeros((1, d_pad), jnp.float32))
        elif s == k - 1:
            rows.append(_pad2(params["bsg"], 1, d_pad))
        else:
            rows.append(_pad2(params[f"bg{s - k}"], 1, d_pad))
    bias_tbl = jnp.stack(rows, axis=0)                    # [num_steps, 1, Dp]
    return w_stack, bias_tbl


def _pack_head(params, d_pad):
    """fc1/fc2/fc3 weights + biases packed into one [3*Dp + 24, Dp] f32 slab.
    Zero padding to Dp columns/rows makes the padded MLP an exact no-op."""
    return jnp.concatenate([
        _pad2(params["wf1"], d_pad, d_pad),
        _pad2(params["wf2"], d_pad, d_pad),
        _pad2(params["wf3"], d_pad, d_pad),
        _pad2(params["bf1"], 8, d_pad),
        _pad2(params["bf2"], 8, d_pad),
        _pad2(params["bf3"], 8, d_pad),
    ], axis=0)


def _sgcn_kernel(k, n_gcn, tm, npg, num_graphs, nb_class,
                 a_ref, h0_ref, w_ref, b_ref, head_ref, out_ref,
                 h_ref, hw_ref):
    f32 = jnp.float32
    bf16 = jnp.bfloat16
    num_steps = k + n_gcn
    n_nodes, d_pad = h_ref.shape
    n_blocks = n_nodes // tm

    s = pl.program_id(0)              # propagation hop / conv layer
    i = pl.program_id(1)              # A_hat row block within the step

    # ---- first grid point: init output block (defensive) + first snapshot --
    @pl.when(jnp.logical_and(s == 0, i == 0))
    def _():
        out_ref[...] = jnp.zeros(out_ref.shape, out_ref.dtype)
        hw_ref[...] = h0_ref[...].astype(bf16)

    # ---- step prologue (i == 0, s > 0): snapshot node state in bf16 --------
    @pl.when(jnp.logical_and(i == 0, s > 0))
    def _():
        hw_ref[...] = h_ref[...].astype(bf16)

    # ---- per row block: val = (A_tile @ H) @ W_s + b_s, optional relu ------
    # W_s is identity for SGConv hops (s < k) and Wg_{s-k} for GCN layers; the
    # extra Dp^2 identity FLOPs per tile are negligible (ratio Dp/N) vs the
    # N*Dp propagation FLOPs, and keep the body branchless.
    ah = jnp.dot(a_ref[...], hw_ref[...], preferred_element_type=f32)   # [tm,Dp]
    val = jnp.dot(ah, w_ref[0], preferred_element_type=f32)             # [tm,Dp]
    val = val + b_ref[0]                                                # [1,Dp]
    floor = jnp.where(s >= k - 1, 0.0, -jnp.inf).astype(f32)            # relu gate
    val = jnp.maximum(val, floor)

    if n_blocks == 1:
        h_ref[...] = val
    else:
        blk = jnp.where(s % 2 == 0, i, n_blocks - 1 - i)      # serpentine order
        row0 = pl.multiple_of(blk * tm, tm)
        h_ref[pl.ds(row0, tm), :] = val

    # ---- final grid point: global_add_pool + MLP head -----------------------
    @pl.when(jnp.logical_and(s == num_steps - 1, i == n_blocks - 1))
    def _():
        h = h_ref[...]
        if npg % 8 == 0:
            pooled = jnp.sum(h.reshape(num_graphs, npg, d_pad), axis=1)  # [G,Dp]
        else:
            # TODO(synk): arbitrary `batch` vectors need a segment-sum path.
            pooled = jnp.concatenate(
                [jnp.sum(h[g * npg:(g + 1) * npg, :], axis=0, keepdims=True)
                 for g in range(num_graphs)], axis=0)
        wf1 = head_ref[0 * d_pad:1 * d_pad, :]
        wf2 = head_ref[1 * d_pad:2 * d_pad, :]
        wf3 = head_ref[2 * d_pad:3 * d_pad, :]
        bf1 = head_ref[3 * d_pad + 0:3 * d_pad + 1, :]
        bf2 = head_ref[3 * d_pad + 8:3 * d_pad + 9, :]
        bf3 = head_ref[3 * d_pad + 16:3 * d_pad + 17, :]
        y = jnp.maximum(jnp.dot(pooled, wf1, preferred_element_type=f32) + bf1,
                        0.0)
        # dropout (p=0.1) is the identity in eval mode.
        y = jnp.maximum(jnp.dot(y, wf2, preferred_element_type=f32) + bf2, 0.0)
        y = jnp.dot(y, wf3, preferred_element_type=f32) + bf3
        out_ref[...] = y[:, :nb_class]


def sgcn_forward(x, a_hat, params, *, k, n_gcn, nodes_per_graph, num_graphs,
                 nb_class, tm=None):
    """Fused SGCN forward pass as one grid-pipelined Pallas call."""
    n = x.shape[0]
    d_model = params["wsg"].shape[1]
    assert k >= 1 and n_gcn >= 0
    assert n == nodes_per_graph * num_graphs
    d_pad = _ceil_to(max(d_model, 1), 128)       # lane-dense node-state width
    num_steps = k + n_gcn
    f32 = jnp.float32
    hp = jax.lax.Precision.HIGHEST

    # H0 = X @ Wsg done once in XLA (A^k (X W) == (A^k X) W); K=in_size matmul
    # is hostile to the MXU and is not worth an in-kernel branch.
    h0 = jnp.dot(x.astype(f32), params["wsg"].astype(f32), precision=hp)
    h0 = jnp.pad(h0, ((0, 0), (0, d_pad - d_model)))

    w_stack, bias_tbl = _build_step_tables(params, k, n_gcn, d_pad)
    head = _pack_head(params, d_pad)
    a_bf16 = a_hat.astype(jnp.bfloat16)

    # ---- VMEM budgeting: derive tile size / limit from the actual device ---
    vmem_cap = _vmem_capacity_bytes()
    vmem_limit = int(vmem_cap * 0.85)            # ~109 MiB v5e/v6e, ~54 MiB v7x
    fixed = (h0.size * 4 + head.size * 4                     # single-buffered
             + 2 * d_pad * d_pad * 4 + 2 * d_pad * 4         # W/bias step blocks
             + n * d_pad * 4 + n * d_pad * 2)                # H f32 + H bf16
    budget = int(vmem_limit * 0.9)
    if tm is None:
        if fixed + n * n * 2 <= budget:
            tm = n                               # A_hat fully VMEM resident
        else:
            avail = max(budget - fixed, 0)
            cap_rows = max(16, avail // (2 * n * 2))   # two bf16 (tm, N) buffers
            tm = 16
            for cand in range(16, min(cap_rows, n) + 1, 16):
                if n % cand == 0:                # largest MXU-aligned divisor
                    tm = cand
    assert n % tm == 0
    assert tm == n or tm % 16 == 0               # bf16 sublane packing for A tiles
    n_blocks = n // tm

    if n_blocks == 1:
        a_index_map = lambda s, i: (0, 0)        # resident: fetched exactly once
    else:
        # Serpentine: last tile of step s is reused as the first tile of s+1.
        a_index_map = lambda s, i: (jnp.where(s % 2 == 0, i, n_blocks - 1 - i), 0)
    w_index_map = lambda s, i: (jnp.where(s < k, 0, s - k + 1), 0, 0)

    kernel = functools.partial(_sgcn_kernel, k, n_gcn, tm, nodes_per_graph,
                               num_graphs, nb_class)

    def _call(use_single_buffering):
        const_mode = ({"pipeline_mode": pl.Buffered(1)}
                      if use_single_buffering else {})
        a_mode = ({"pipeline_mode": pl.Buffered(1)}
                  if (use_single_buffering and n_blocks == 1) else {})
        grid_spec = pltpu.PrefetchScalarGridSpec(
            num_scalar_prefetch=0,
            grid=(num_steps, n_blocks),
            in_specs=[
                pl.BlockSpec((tm, n), a_index_map, **a_mode),          # A_hat
                pl.BlockSpec((n, d_pad), lambda s, i: (0, 0),
                             **const_mode),                            # H0
                pl.BlockSpec((1, d_pad, d_pad), w_index_map),          # W_s
                pl.BlockSpec((1, 1, d_pad), lambda s, i: (s, 0, 0)),   # bias_s
                pl.BlockSpec(head.shape, lambda s, i: (0, 0),
                             **const_mode),                            # fc head
            ],
            out_specs=pl.BlockSpec((num_graphs, nb_class), lambda s, i: (0, 0)),
            scratch_shapes=[
                pltpu.VMEM((n, d_pad), jnp.float32),    # node state H
                pltpu.VMEM((n, d_pad), jnp.bfloat16),   # per-step bf16 snapshot
            ],
        )
        out = pl.pallas_call(
            kernel,
            out_shape=jax.ShapeDtypeStruct((num_graphs, nb_class), jnp.float32),
            grid_spec=grid_spec,
            compiler_params=pltpu.CompilerParams(
                # Both axes carry state through VMEM scratch -> "arbitrary".
                dimension_semantics=("arbitrary", "arbitrary"),
                vmem_limit_bytes=vmem_limit,
            ),
        )(a_bf16, h0, w_stack, bias_tbl, head)
        return jax.block_until_ready(out)

    try:
        return _call(True)
    except Exception:
        # Older JAX without BlockSpec(pipeline_mode=...): default double
        # buffering costs VMEM, not correctness.
        return _call(False)


# ----------------------------- references -----------------------------------

def _reference_forward_f32(x, a_hat, batch, params, *, k, n_gcn, num_graphs):
    """Pure-f32 reference in the original module ordering (spec check)."""
    hp = jax.lax.Precision.HIGHEST
    h = x
    for _ in range(k):
        h = jnp.dot(a_hat, h, precision=hp)
    h = jax.nn.relu(jnp.dot(h, params["wsg"], precision=hp) + params["bsg"])
    for l in range(n_gcn):
        hw = jnp.dot(h, params[f"wg{l}"], precision=hp)
        h = jax.nn.relu(jnp.dot(a_hat, hw, precision=hp) + params[f"bg{l}"])
    pooled = jax.ops.segment_sum(h, batch, num_segments=num_graphs)
    y = jax.nn.relu(jnp.dot(pooled, params["wf1"], precision=hp) + params["bf1"])
    y = jax.nn.relu(jnp.dot(y, params["wf2"], precision=hp) + params["bf2"])
    return jnp.dot(y, params["wf3"], precision=hp) + params["bf3"]


def _reference_forward_mirror(x, a_hat, params, *, k, n_gcn, nodes_per_graph,
                              num_graphs):
    """Mirrors the kernel numerics: bf16 A / bf16 H propagation with f32
    accumulation and (A @ H) @ W ordering; f32 weight-apply and fc head."""
    f32 = jnp.float32
    hp = jax.lax.Precision.HIGHEST
    a_bf = a_hat.astype(jnp.bfloat16)
    h = jnp.dot(x, params["wsg"], precision=hp)
    for s in range(k):
        h = jnp.dot(a_bf, h.astype(jnp.bfloat16), preferred_element_type=f32)
        if s == k - 1:
            h = jax.nn.relu(h + params["bsg"])
    for l in range(n_gcn):
        ah = jnp.dot(a_bf, h.astype(jnp.bfloat16), preferred_element_type=f32)
        h = jax.nn.relu(jnp.dot(ah, params[f"wg{l}"], precision=hp)
                        + params[f"bg{l}"])
    pooled = h.reshape(num_graphs, nodes_per_graph, -1).sum(axis=1)
    y = jax.nn.relu(jnp.dot(pooled, params["wf1"], precision=hp) + params["bf1"])
    y = jax.nn.relu(jnp.dot(y, params["wf2"], precision=hp) + params["bf2"])
    return jnp.dot(y, params["wf3"], precision=hp) + params["bf3"]


def _gcn_norm_dense(edge_index, num_nodes):
    """A_hat = D^{-1/2} (A + I) D^{-1/2}, A[t, s] = 1 for edge s -> t."""
    src, dst = edge_index[0], edge_index[1]
    a = jnp.zeros((num_nodes, num_nodes), jnp.float32)
    a = a.at[dst, src].add(1.0)
    a = a + jnp.eye(num_nodes, dtype=jnp.float32)
    deg = a.sum(axis=1)
    dinv = jnp.where(deg > 0, jax.lax.rsqrt(deg), 0.0)
    return dinv[:, None] * a * dinv[None, :]


if __name__ == "__main__":
    # Small shapes consistent with the module.
    in_size, nb_class, d_model, k = 4, 3, 32, 2
    n_gcn = 3                                   # nb_layers - 1
    nodes_per_graph, num_graphs = 16, 2
    n = nodes_per_graph * num_graphs            # 32 nodes

    key = jax.random.PRNGKey(0)
    keys = jax.random.split(key, 16)

    x = jax.random.normal(keys[0], (n, in_size), jnp.float32)

    # Two ring graphs (symmetric edges) and the node -> graph assignment.
    edges = []
    for g in range(num_graphs):
        off = g * nodes_per_graph
        for ii in range(nodes_per_graph):
            a_node = off + ii
            b_node = off + (ii + 1) % nodes_per_graph
            edges.append((a_node, b_node))
            edges.append((b_node, a_node))
    edge_index = jnp.asarray(edges, jnp.int32).T                 # [2, E]
    batch = jnp.repeat(jnp.arange(num_graphs), nodes_per_graph)  # [N]

    a_hat = _gcn_norm_dense(edge_index, n)                       # [N, N]

    # Deterministic synthetic parameters, stored pre-transposed as [in, out]
    # so the kernel computes x @ W directly (== x @ W_torch^T).
    def w(kk, i, o):
        return 0.1 * jax.random.normal(kk, (i, o), jnp.float32)

    def b(kk, o):
        return 0.1 * jax.random.normal(kk, (1, o), jnp.float32)

    params = {
        "wsg": w(keys[1], in_size, d_model), "bsg": b(keys[2], d_model),
        "wg0": w(keys[3], d_model, d_model), "bg0": b(keys[4], d_model),
        "wg1": w(keys[5], d_model, d_model), "bg1": b(keys[6], d_model),
        "wg2": w(keys[7], d_model, d_model), "bg2": b(keys[8], d_model),
        "wf1": w(keys[9], d_model, d_model), "bf1": b(keys[10], d_model),
        "wf2": w(keys[11], d_model, d_model // 2), "bf2": b(keys[12], d_model // 2),
        "wf3": w(keys[13], d_model // 2, nb_class), "bf3": b(keys[14], nb_class),
    }

    common = dict(k=k, n_gcn=n_gcn, nodes_per_graph=nodes_per_graph,
                  num_graphs=num_graphs, nb_class=nb_class)

    # Path 1: auto-tiled -> A_hat fully VMEM resident (tm = N, single buffer).
    out_resident = jax.block_until_ready(sgcn_forward(x, a_hat, params, **common))
    assert out_resident.shape == (num_graphs, nb_class)

    # Path 2: forced streaming (tm=16 -> 2 row blocks, serpentine traversal).
    out_stream = jax.block_until_ready(
        sgcn_forward(x, a_hat, params, tm=16, **common))
    assert out_stream.shape == (num_graphs, nb_class)

    # Tight check against a reference that mirrors the kernel's numerics.
    ref_mirror = _reference_forward_mirror(x, a_hat, params, k=k, n_gcn=n_gcn,
                                           nodes_per_graph=nodes_per_graph,
                                           num_graphs=num_graphs)
    assert jnp.allclose(out_resident, ref_mirror, atol=1e-2, rtol=1e-2), \
        "resident path: mismatch vs mirrored bf16 reference"
    assert jnp.allclose(out_stream, ref_mirror, atol=1e-2, rtol=1e-2), \
        "streaming path: mismatch vs mirrored bf16 reference"

    # Loose check against the pure-f32 module spec (bf16 propagation delta).
    ref_f32 = _reference_forward_f32(x, a_hat, batch, params, k=k, n_gcn=n_gcn,
                                     num_graphs=num_graphs)
    assert jnp.allclose(out_resident, ref_f32, atol=5e-2, rtol=5e-2), \
        "resident path: mismatch vs f32 spec reference"
    assert jnp.allclose(out_stream, ref_f32, atol=5e-2, rtol=5e-2), \
        "streaming path: mismatch vs f32 spec reference"

    print("KERNEL_OK")
</pallas_src>

<mosaic_0001>
module attributes {stable_mosaic.version = 11 : i64} {
  func.func @_sgcn_kernel(%arg0: i32, %arg1: i32, %arg2: memref<32x32xbf16, #tpu.memory_space<vmem>>, %arg3: memref<32x128xf32, #tpu.memory_space<vmem>>, %arg4: memref<1x128x128xf32, #tpu.memory_space<vmem>>, %arg5: memref<1x1x128xf32, #tpu.memory_space<vmem>>, %arg6: memref<408x128xf32, #tpu.memory_space<vmem>>, %arg7: memref<2x3xf32, #tpu.memory_space<vmem>>, %arg8: memref<32x128xf32, #tpu.memory_space<vmem>>, %arg9: memref<32x128xbf16, #tpu.memory_space<vmem>>) attributes {dimension_semantics = [#tpu.dimension_semantics<arbitrary>, #tpu.dimension_semantics<arbitrary>], iteration_bounds = array<i64: 5, 1>, scalar_prefetch = 0 : i64, scratch_operands = 2 : i64, tpu.core_type = #tpu.core_type<tc>, window_params = [{pipeline_mode = #tpu.pipeline_mode<synchronous>, transform_indices = @transform_0, window_bounds = array<i64: 32, 32>}, {pipeline_mode = #tpu.pipeline_mode<synchronous>, transform_indices = @transform_1, window_bounds = array<i64: 32, 128>}, {transform_indices = @transform_2, window_bounds = array<i64: 1, 128, 128>}, {transform_indices = @transform_3, window_bounds = array<i64: 1, 1, 128>}, {pipeline_mode = #tpu.pipeline_mode<synchronous>, transform_indices = @transform_4, window_bounds = array<i64: 408, 128>}, {pipeline_mode = #tpu.pipeline_mode<synchronous>, transform_indices = @transform_5, window_bounds = array<i64: 2, 3>}]} {
    %c0_i32 = arith.constant 0 : i32
    %0 = arith.cmpi eq, %arg0, %c0_i32 : i32
    %c0_i32_0 = arith.constant 0 : i32
    %1 = arith.cmpi eq, %arg1, %c0_i32_0 : i32
    %2 = arith.andi %0, %1 : i1
    %3 = arith.extui %2 : i1 to i32
    %c0_i32_1 = arith.constant 0 : i32
    %4 = arith.cmpi ne, %3, %c0_i32_1 : i32
    scf.if %4 {
      %cst_21 = arith.constant 0.000000e+00 : f32
      %30 = vector.broadcast %cst_21 : f32 to vector<2x3xf32>
      %c0_22 = arith.constant 0 : index
      %c0_23 = arith.constant 0 : index
      %31 = vector.load %arg7[%c0_22, %c0_23] : memref<2x3xf32, #tpu.memory_space<vmem>>, vector<2x3xf32>
      tpu.vector_store %arg7[%c0_22, %c0_23], %30 {strides = array<i32>} : memref<2x3xf32, #tpu.memory_space<vmem>>, vector<2x3xf32>,
      %c0_24 = arith.constant 0 : index
      %c0_25 = arith.constant 0 : index
      %32 = vector.load %arg3[%c0_24, %c0_25] : memref<32x128xf32, #tpu.memory_space<vmem>>, vector<32x128xf32>
      %33 = arith.truncf %32 : vector<32x128xf32> to vector<32x128xbf16>
      %c0_26 = arith.constant 0 : index
      %c0_27 = arith.constant 0 : index
      %34 = vector.load %arg9[%c0_26, %c0_27] : memref<32x128xbf16, #tpu.memory_space<vmem>>, vector<32x128xbf16>
      tpu.vector_store %arg9[%c0_26, %c0_27], %33 {strides = array<i32>} : memref<32x128xbf16, #tpu.memory_space<vmem>>, vector<32x128xbf16>,
    } else {
    }
    %c0_i32_2 = arith.constant 0 : i32
    %5 = arith.cmpi eq, %arg1, %c0_i32_2 : i32
    %c0_i32_3 = arith.constant 0 : i32
    %6 = arith.cmpi sgt, %arg0, %c0_i32_3 : i32
    %7 = arith.andi %5, %6 : i1
    %8 = arith.extui %7 : i1 to i32
    %c0_i32_4 = arith.constant 0 : i32
    %9 = arith.cmpi ne, %8, %c0_i32_4 : i32
    scf.if %9 {
      %c0_21 = arith.constant 0 : index
      %c0_22 = arith.constant 0 : index
      %30 = vector.load %arg8[%c0_21, %c0_22] : memref<32x128xf32, #tpu.memory_space<vmem>>, vector<32x128xf32>
      %31 = arith.truncf %30 : vector<32x128xf32> to vector<32x128xbf16>
      %c0_23 = arith.constant 0 : index
      %c0_24 = arith.constant 0 : index
      %32 = vector.load %arg9[%c0_23, %c0_24] : memref<32x128xbf16, #tpu.memory_space<vmem>>, vector<32x128xbf16>
      tpu.vector_store %arg9[%c0_23, %c0_24], %31 {strides = array<i32>} : memref<32x128xbf16, #tpu.memory_space<vmem>>, vector<32x128xbf16>,
    } else {
    }
    %c0 = arith.constant 0 : index
    %c0_5 = arith.constant 0 : index
    %10 = vector.load %arg2[%c0, %c0_5] : memref<32x32xbf16, #tpu.memory_space<vmem>>, vector<32x32xbf16>
    %c0_6 = arith.constant 0 : index
    %c0_7 = arith.constant 0 : index
    %11 = vector.load %arg9[%c0_6, %c0_7] : memref<32x128xbf16, #tpu.memory_space<vmem>>, vector<32x128xbf16>
    %cst = arith.constant dense<0.000000e+00> : vector<32x128xf32>
    %12 = tpu.matmul %10, %11, %cst {dimension_numbers = #tpu.dot_dimension_numbers<[1], [0], [0], [1], [0, 0, 1, 1], [], []>} : vector<32x32xbf16>, vector<32x128xbf16>, vector<32x128xf32> -> vector<32x128xf32>
    %c0_8 = arith.constant 0 : index
    %c0_9 = arith.constant 0 : index
    %c0_10 = arith.constant 0 : index
    %13 = vector.load %arg4[%c0_8, %c0_9, %c0_10] : memref<1x128x128xf32, #tpu.memory_space<vmem>>, vector<1x128x128xf32>
    %14 = vector.shape_cast %13 : vector<1x128x128xf32> to vector<128x128xf32>
    %cst_11 = arith.constant dense<0.000000e+00> : vector<32x128xf32>
    %15 = tpu.matmul %12, %14, %cst_11 {dimension_numbers = #tpu.dot_dimension_numbers<[1], [0], [0], [1], [0, 0, 1, 1], [], []>} : vector<32x128xf32>, vector<128x128xf32>, vector<32x128xf32> -> vector<32x128xf32>
    %c0_12 = arith.constant 0 : index
    %c0_13 = arith.constant 0 : index
    %c0_14 = arith.constant 0 : index
    %16 = vector.load %arg5[%c0_12, %c0_13, %c0_14] : memref<1x1x128xf32, #tpu.memory_space<vmem>>, vector<1x1x128xf32>
    %17 = vector.shape_cast %16 : vector<1x1x128xf32> to vector<1x128xf32>
    %18 = vector.broadcast %17 : vector<1x128xf32> to vector<32x128xf32>
    %19 = arith.addf %15, %18 : vector<32x128xf32>
    %c1_i32 = arith.constant 1 : i32
    %20 = arith.cmpi sge, %arg0, %c1_i32 : i32
    %cst_15 = arith.constant 0.000000e+00 : f32
    %cst_16 = arith.constant 0xFF800000 : f32
    %21 = arith.select %20, %cst_15, %cst_16 : f32
    %22 = vector.broadcast %21 : f32 to vector<32x128xf32>
    %23 = arith.maximumf %19, %22 : vector<32x128xf32>
    %c0_17 = arith.constant 0 : index
    %c0_18 = arith.constant 0 : index
    %24 = vector.load %arg8[%c0_17, %c0_18] : memref<32x128xf32, #tpu.memory_space<vmem>>, vector<32x128xf32>
    tpu.vector_store %arg8[%c0_17, %c0_18], %23 {strides = array<i32>} : memref<32x128xf32, #tpu.memory_space<vmem>>, vector<32x128xf32>,
    %c4_i32 = arith.constant 4 : i32
    %25 = arith.cmpi eq, %arg0, %c4_i32 : i32
    %c0_i32_19 = arith.constant 0 : i32
    %26 = arith.cmpi eq, %arg1, %c0_i32_19 : i32
    %27 = arith.andi %25, %26 : i1
    %28 = arith.extui %27 : i1 to i32
    %c0_i32_20 = arith.constant 0 : i32
    %29 = arith.cmpi ne, %28, %c0_i32_20 : i32
    scf.if %29 {
      %c0_21 = arith.constant 0 : index
      %c0_22 = arith.constant 0 : index
      %30 = vector.load %arg8[%c0_21, %c0_22] : memref<32x128xf32, #tpu.memory_space<vmem>>, vector<32x128xf32>
      %31 = vector.shape_cast %30 : vector<32x128xf32> to vector<2x16x128xf32>
      %cst_23 = arith.constant dense<0.000000e+00> : vector<2x128xf32>
      %32 = vector.multi_reduction <add>, %31, %cst_23 [1] : vector<2x16x128xf32> to vector<2x128xf32>
      %c0_24 = arith.constant 0 : index
      %c0_25 = arith.constant 0 : index
      %33 = vector.load %arg6[%c0_24, %c0_25] : memref<408x128xf32, #tpu.memory_space<vmem>>, vector<128x128xf32>
      %c128 = arith.constant 128 : index
      %c0_26 = arith.constant 0 : index
      %34 = vector.load %arg6[%c128, %c0_26] : memref<408x128xf32, #tpu.memory_space<vmem>>, vector<128x128xf32>
      %c256 = arith.constant 256 : index
      %c0_27 = arith.constant 0 : index
      %35 = vector.load %arg6[%c256, %c0_27] : memref<408x128xf32, #tpu.memory_space<vmem>>, vector<128x128xf32>
      %c384 = arith.constant 384 : index
      %c0_28 = arith.constant 0 : index
      %36 = vector.load %arg6[%c384, %c0_28] : memref<408x128xf32, #tpu.memory_space<vmem>>, vector<1x128xf32>
      %c392 = arith.constant 392 : index
      %c0_29 = arith.constant 0 : index
      %37 = vector.load %arg6[%c392, %c0_29] : memref<408x128xf32, #tpu.memory_space<vmem>>, vector<1x128xf32>
      %c400 = arith.constant 400 : index
      %c0_30 = arith.constant 0 : index
      %38 = vector.load %arg6[%c400, %c0_30] : memref<408x128xf32, #tpu.memory_space<vmem>>, vector<1x128xf32>
      %cst_31 = arith.constant dense<0.000000e+00> : vector<2x128xf32>
      %39 = tpu.matmul %32, %33, %cst_31 {dimension_numbers = #tpu.dot_dimension_numbers<[1], [0], [0], [1], [0, 0, 1, 1], [], []>} : vector<2x128xf32>, vector<128x128xf32>, vector<2x128xf32> -> vector<2x128xf32>
      %40 = vector.broadcast %36 : vector<1x128xf32> to vector<2x128xf32>
      %41 = arith.addf %39, %40 : vector<2x128xf32>
      %cst_32 = arith.constant 0.000000e+00 : f32
      %42 = vector.broadcast %cst_32 : f32 to vector<2x128xf32>
      %43 = arith.maximumf %41, %42 : vector<2x128xf32>
      %cst_33 = arith.constant dense<0.000000e+00> : vector<2x128xf32>
      %44 = tpu.matmul %43, %34, %cst_33 {dimension_numbers = #tpu.dot_dimension_numbers<[1], [0], [0], [1], [0, 0, 1, 1], [], []>} : vector<2x128xf32>, vector<128x128xf32>, vector<2x128xf32> -> vector<2x128xf32>
      %45 = vector.broadcast %37 : vector<1x128xf32> to vector<2x128xf32>
      %46 = arith.addf %44, %45 : vector<2x128xf32>
      %cst_34 = arith.constant 0.000000e+00 : f32
      %47 = vector.broadcast %cst_34 : f32 to vector<2x128xf32>
      %48 = arith.maximumf %46, %47 : vector<2x128xf32>
      %cst_35 = arith.constant dense<0.000000e+00> : vector<2x128xf32>
      %49 = tpu.matmul %48, %35, %cst_35 {dimension_numbers = #tpu.dot_dimension_numbers<[1], [0], [0], [1], [0, 0, 1, 1], [], []>} : vector<2x128xf32>, vector<128x128xf32>, vector<2x128xf32> -> vector<2x128xf32>
      %50 = vector.broadcast %38 : vector<1x128xf32> to vector<2x128xf32>
      %51 = arith.addf %49, %50 : vector<2x128xf32>
      %52 = vector.extract_strided_slice %51 {offsets = [0, 0], sizes = [2, 3], strides = [1, 1]} : vector<2x128xf32> to vector<2x3xf32>
      %c0_36 = arith.constant 0 : index
      %c0_37 = arith.constant 0 : index
      %53 = vector.load %arg7[%c0_36, %c0_37] : memref<2x3xf32, #tpu.memory_space<vmem>>, vector<2x3xf32>
      tpu.vector_store %arg7[%c0_36, %c0_37], %52 {strides = array<i32>} : memref<2x3xf32, #tpu.memory_space<vmem>>, vector<2x3xf32>,
    } else {
    }
    return
  }
  func.func @transform_0(%arg0: i32, %arg1: i32) -> (i32, i32) {
    %c0_i32 = arith.constant 0 : i32
    %c0_i32_0 = arith.constant 0 : i32
    %c0_i32_1 = arith.constant 0 : i32
    return %c0_i32, %c0_i32_0 : i32, i32
  }
  func.func @transform_1(%arg0: i32, %arg1: i32) -> (i32, i32) {
    %c0_i32 = arith.constant 0 : i32
    %c0_i32_0 = arith.constant 0 : i32
    %c0_i32_1 = arith.constant 0 : i32
    return %c0_i32, %c0_i32_0 : i32, i32
  }
  func.func @transform_2(%arg0: i32, %arg1: i32) -> (i32, i32, i32) {
    %c2_i32 = arith.constant 2 : i32
    %0 = arith.cmpi slt, %arg0, %c2_i32 : i32
    %c2_i32_0 = arith.constant 2 : i32
    %1 = arith.subi %arg0, %c2_i32_0 : i32
    %c1_i32 = arith.constant 1 : i32
    %2 = arith.addi %1, %c1_i32 : i32
    %c0_i32 = arith.constant 0 : i32
    %3 = arith.select %0, %c0_i32, %2 : i32
    %c0_i32_1 = arith.constant 0 : i32
    %c0_i32_2 = arith.constant 0 : i32
    %c0_i32_3 = arith.constant 0 : i32
    return %3, %c0_i32_1, %c0_i32_2 : i32, i32, i32
  }
  func.func @transform_3(%arg0: i32, %arg1: i32) -> (i32, i32, i32) {
    %c0_i32 = arith.constant 0 : i32
    %c0_i32_0 = arith.constant 0 : i32
    %c0_i32_1 = arith.constant 0 : i32
    return %arg0, %c0_i32, %c0_i32_0 : i32, i32, i32
  }
  func.func @transform_4(%arg0: i32, %arg1: i32) -> (i32, i32) {
    %c0_i32 = arith.constant 0 : i32
    %c0_i32_0 = arith.constant 0 : i32
    %c0_i32_1 = arith.constant 0 : i32
    return %c0_i32, %c0_i32_0 : i32, i32
  }
  func.func @transform_5(%arg0: i32, %arg1: i32) -> (i32, i32) {
    %c0_i32 = arith.constant 0 : i32
    %c0_i32_0 = arith.constant 0 : i32
    %c0_i32_1 = arith.constant 0 : i32
    return %c0_i32, %c0_i32_0 : i32, i32
  }
}

module attributes {stable_mosaic.version = 11 : i64} {
  func.func @_sgcn_kernel(%arg0: i32, %arg1: i32, %arg2: memref<32x32xbf16, #tpu.memory_space<vmem>>, %arg3: memref<32x128xf32, #tpu.memory_space<vmem>>, %arg4: memref<1x128x128xf32, #tpu.memory_space<vmem>>, %arg5: memref<1x1x128xf32, #tpu.memory_space<vmem>>, %arg6: memref<408x128xf32, #tpu.memory_space<vmem>>, %arg7: memref<2x3xf32, #tpu.memory_space<vmem>>, %arg8: memref<32x128xf32, #tpu.memory_space<vmem>>, %arg9: memref<32x128xbf16, #tpu.memory_space<vmem>>) attributes {dimension_semantics = [#tpu.dimension_semantics<arbitrary>, #tpu.dimension_semantics<arbitrary>], iteration_bounds = array<i64: 5, 1>, scalar_prefetch = 0 : i64, scratch_operands = 2 : i64, tpu.core_type = #tpu.core_type<tc>, window_params = [{pipeline_mode = #tpu.pipeline_mode<synchronous>, transform_indices = @transform_0, window_bounds = array<i64: 32, 32>}, {pipeline_mode = #tpu.pipeline_mode<synchronous>, transform_indices = @transform_1, window_bounds = array<i64: 32, 128>}, {transform_indices = @transform_2, window_bounds = array<i64: 1, 128, 128>}, {transform_indices = @transform_3, window_bounds = array<i64: 1, 1, 128>}, {pipeline_mode = #tpu.pipeline_mode<synchronous>, transform_indices = @transform_4, window_bounds = array<i64: 408, 128>}, {pipeline_mode = #tpu.pipeline_mode<synchronous>, transform_indices = @transform_5, window_bounds = array<i64: 2, 3>}]} {
    %c0_i32 = arith.constant 0 : i32
    %0 = arith.cmpi eq, %arg0, %c0_i32 : i32
    %c0_i32_0 = arith.constant 0 : i32
    %1 = arith.cmpi eq, %arg1, %c0_i32_0 : i32
    %2 = arith.andi %0, %1 : i1
    %3 = arith.extui %2 : i1 to i32
    %c0_i32_1 = arith.constant 0 : i32
    %4 = arith.cmpi ne, %3, %c0_i32_1 : i32
    scf.if %4 {
      %cst_21 = arith.constant 0.000000e+00 : f32
      %30 = vector.broadcast %cst_21 : f32 to vector<2x3xf32>
      %c0_22 = arith.constant 0 : index
      %c0_23 = arith.constant 0 : index
      %31 = vector.load %arg7[%c0_22, %c0_23] : memref<2x3xf32, #tpu.memory_space<vmem>>, vector<2x3xf32>
      tpu.vector_store %arg7[%c0_22, %c0_23], %30 {strides = array<i32>} : memref<2x3xf32, #tpu.memory_space<vmem>>, vector<2x3xf32>,
      %c0_24 = arith.constant 0 : index
      %c0_25 = arith.constant 0 : index
      %32 = vector.load %arg3[%c0_24, %c0_25] : memref<32x128xf32, #tpu.memory_space<vmem>>, vector<32x128xf32>
      %33 = arith.truncf %32 : vector<32x128xf32> to vector<32x128xbf16>
      %c0_26 = arith.constant 0 : index
      %c0_27 = arith.constant 0 : index
      %34 = vector.load %arg9[%c0_26, %c0_27] : memref<32x128xbf16, #tpu.memory_space<vmem>>, vector<32x128xbf16>
      tpu.vector_store %arg9[%c0_26, %c0_27], %33 {strides = array<i32>} : memref<32x128xbf16, #tpu.memory_space<vmem>>, vector<32x128xbf16>,
    } else {
    }
    %c0_i32_2 = arith.constant 0 : i32
    %5 = arith.cmpi eq, %arg1, %c0_i32_2 : i32
    %c0_i32_3 = arith.constant 0 : i32
    %6 = arith.cmpi sgt, %arg0, %c0_i32_3 : i32
    %7 = arith.andi %5, %6 : i1
    %8 = arith.extui %7 : i1 to i32
    %c0_i32_4 = arith.constant 0 : i32
    %9 = arith.cmpi ne, %8, %c0_i32_4 : i32
    scf.if %9 {
      %c0_21 = arith.constant 0 : index
      %c0_22 = arith.constant 0 : index
      %30 = vector.load %arg8[%c0_21, %c0_22] : memref<32x128xf32, #tpu.memory_space<vmem>>, vector<32x128xf32>
      %31 = arith.truncf %30 : vector<32x128xf32> to vector<32x128xbf16>
      %c0_23 = arith.constant 0 : index
      %c0_24 = arith.constant 0 : index
      %32 = vector.load %arg9[%c0_23, %c0_24] : memref<32x128xbf16, #tpu.memory_space<vmem>>, vector<32x128xbf16>
      tpu.vector_store %arg9[%c0_23, %c0_24], %31 {strides = array<i32>} : memref<32x128xbf16, #tpu.memory_space<vmem>>, vector<32x128xbf16>,
    } else {
    }
    %c0 = arith.constant 0 : index
    %c0_5 = arith.constant 0 : index
    %10 = vector.load %arg2[%c0, %c0_5] : memref<32x32xbf16, #tpu.memory_space<vmem>>, vector<32x32xbf16>
    %c0_6 = arith.constant 0 : index
    %c0_7 = arith.constant 0 : index
    %11 = vector.load %arg9[%c0_6, %c0_7] : memref<32x128xbf16, #tpu.memory_space<vmem>>, vector<32x128xbf16>
    %cst = arith.constant dense<0.000000e+00> : vector<32x128xf32>
    %12 = tpu.matmul %10, %11, %cst {dimension_numbers = #tpu.dot_dimension_numbers<[1], [0], [0], [1], [0, 0, 1, 1], [], []>} : vector<32x32xbf16>, vector<32x128xbf16>, vector<32x128xf32> -> vector<32x128xf32>
    %c0_8 = arith.constant 0 : index
    %c0_9 = arith.constant 0 : index
    %c0_10 = arith.constant 0 : index
    %13 = vector.load %arg4[%c0_8, %c0_9, %c0_10] : memref<1x128x128xf32, #tpu.memory_space<vmem>>, vector<1x128x128xf32>
    %14 = vector.shape_cast %13 : vector<1x128x128xf32> to vector<128x128xf32>
    %cst_11 = arith.constant dense<0.000000e+00> : vector<32x128xf32>
    %15 = tpu.matmul %12, %14, %cst_11 {dimension_numbers = #tpu.dot_dimension_numbers<[1], [0], [0], [1], [0, 0, 1, 1], [], []>} : vector<32x128xf32>, vector<128x128xf32>, vector<32x128xf32> -> vector<32x128xf32>
    %c0_12 = arith.constant 0 : index
    %c0_13 = arith.constant 0 : index
    %c0_14 = arith.constant 0 : index
    %16 = vector.load %arg5[%c0_12, %c0_13, %c0_14] : memref<1x1x128xf32, #tpu.memory_space<vmem>>, vector<1x1x128xf32>
    %17 = vector.shape_cast %16 : vector<1x1x128xf32> to vector<1x128xf32>
    %18 = vector.broadcast %17 : vector<1x128xf32> to vector<32x128xf32>
    %19 = arith.addf %15, %18 : vector<32x128xf32>
    %c1_i32 = arith.constant 1 : i32
    %20 = arith.cmpi sge, %arg0, %c1_i32 : i32
    %cst_15 = arith.constant 0.000000e+00 : f32
    %cst_16 = arith.constant 0xFF800000 : f32
    %21 = arith.select %20, %cst_15, %cst_16 : f32
    %22 = vector.broadcast %21 : f32 to vector<32x128xf32>
    %23 = arith.maximumf %19, %22 : vector<32x128xf32>
    %c0_17 = arith.constant 0 : index
    %c0_18 = arith.constant 0 : index
    %24 = vector.load %arg8[%c0_17, %c0_18] : memref<32x128xf32, #tpu.memory_space<vmem>>, vector<32x128xf32>
    tpu.vector_store %arg8[%c0_17, %c0_18], %23 {strides = array<i32>} : memref<32x128xf32, #tpu.memory_space<vmem>>, vector<32x128xf32>,
    %c4_i32 = arith.constant 4 : i32
    %25 = arith.cmpi eq, %arg0, %c4_i32 : i32
    %c0_i32_19 = arith.constant 0 : i32
    %26 = arith.cmpi eq, %arg1, %c0_i32_19 : i32
    %27 = arith.andi %25, %26 : i1
    %28 = arith.extui %27 : i1 to i32
    %c0_i32_20 = arith.constant 0 : i32
    %29 = arith.cmpi ne, %28, %c0_i32_20 : i32
    scf.if %29 {
      %c0_21 = arith.constant 0 : index
      %c0_22 = arith.constant 0 : index
      %30 = vector.load %arg8[%c0_21, %c0_22] : memref<32x128xf32, #tpu.memory_space<vmem>>, vector<32x128xf32>
      %31 = vector.shape_cast %30 : vector<32x128xf32> to vector<2x16x128xf32>
      %cst_23 = arith.constant dense<0.000000e+00> : vector<2x128xf32>
      %32 = vector.multi_reduction <add>, %31, %cst_23 [1] : vector<2x16x128xf32> to vector<2x128xf32>
      %c0_24 = arith.constant 0 : index
      %c0_25 = arith.constant 0 : index
      %33 = vector.load %arg6[%c0_24, %c0_25] : memref<408x128xf32, #tpu.memory_space<vmem>>, vector<128x128xf32>
      %c128 = arith.constant 128 : index
      %c0_26 = arith.constant 0 : index
      %34 = vector.load %arg6[%c128, %c0_26] : memref<408x128xf32, #tpu.memory_space<vmem>>, vector<128x128xf32>
      %c256 = arith.constant 256 : index
      %c0_27 = arith.constant 0 : index
      %35 = vector.load %arg6[%c256, %c0_27] : memref<408x128xf32, #tpu.memory_space<vmem>>, vector<128x128xf32>
      %c384 = arith.constant 384 : index
      %c0_28 = arith.constant 0 : index
      %36 = vector.load %arg6[%c384, %c0_28] : memref<408x128xf32, #tpu.memory_space<vmem>>, vector<1x128xf32>
      %c392 = arith.constant 392 : index
      %c0_29 = arith.constant 0 : index
      %37 = vector.load %arg6[%c392, %c0_29] : memref<408x128xf32, #tpu.memory_space<vmem>>, vector<1x128xf32>
      %c400 = arith.constant 400 : index
      %c0_30 = arith.constant 0 : index
      %38 = vector.load %arg6[%c400, %c0_30] : memref<408x128xf32, #tpu.memory_space<vmem>>, vector<1x128xf32>
      %cst_31 = arith.constant dense<0.000000e+00> : vector<2x128xf32>
      %39 = tpu.matmul %32, %33, %cst_31 {dimension_numbers = #tpu.dot_dimension_numbers<[1], [0], [0], [1], [0, 0, 1, 1], [], []>} : vector<2x128xf32>, vector<128x128xf32>, vector<2x128xf32> -> vector<2x128xf32>
      %40 = vector.broadcast %36 : vector<1x128xf32> to vector<2x128xf32>
      %41 = arith.addf %39, %40 : vector<2x128xf32>
      %cst_32 = arith.constant 0.000000e+00 : f32
      %42 = vector.broadcast %cst_32 : f32 to vector<2x128xf32>
      %43 = arith.maximumf %41, %42 : vector<2x128xf32>
      %cst_33 = arith.constant dense<0.000000e+00> : vector<2x128xf32>
      %44 = tpu.matmul %43, %34, %cst_33 {dimension_numbers = #tpu.dot_dimension_numbers<[1], [0], [0], [1], [0, 0, 1, 1], [], []>} : vector<2x128xf32>, vector<128x128xf32>, vector<2x128xf32> -> vector<2x128xf32>
      %45 = vector.broadcast %37 : vector<1x128xf32> to vector<2x128xf32>
      %46 = arith.addf %44, %45 : vector<2x128xf32>
      %cst_34 = arith.constant 0.000000e+00 : f32
      %47 = vector.broadcast %cst_34 : f32 to vector<2x128xf32>
      %48 = arith.maximumf %46, %47 : vector<2x128xf32>
      %cst_35 = arith.constant dense<0.000000e+00> : vector<2x128xf32>
      %49 = tpu.matmul %48, %35, %cst_35 {dimension_numbers = #tpu.dot_dimension_numbers<[1], [0], [0], [1], [0, 0, 1, 1], [], []>} : vector<2x128xf32>, vector<128x128xf32>, vector<2x128xf32> -> vector<2x128xf32>
      %50 = vector.broadcast %38 : vector<1x128xf32> to vector<2x128xf32>
      %51 = arith.addf %49, %50 : vector<2x128xf32>
      %52 = vector.extract_strided_slice %51 {offsets = [0, 0], sizes = [2, 3], strides = [1, 1]} : vector<2x128xf32> to vector<2x3xf32>
      %c0_36 = arith.constant 0 : index
      %c0_37 = arith.constant 0 : index
      %53 = vector.load %arg7[%c0_36, %c0_37] : memref<2x3xf32, #tpu.memory_space<vmem>>, vector<2x3xf32>
      tpu.vector_store %arg7[%c0_36, %c0_37], %52 {strides = array<i32>} : memref<2x3xf32, #tpu.memory_space<vmem>>, vector<2x3xf32>,
    } else {
    }
    return
  }
  func.func @transform_0(%arg0: i32, %arg1: i32) -> (i32, i32) {
    %c0_i32 = arith.constant 0 : i32
    %c0_i32_0 = arith.constant 0 : i32
    %c0_i32_1 = arith.constant 0 : i32
    return %c0_i32, %c0_i32_0 : i32, i32
  }
  func.func @transform_1(%arg0: i32, %arg1: i32) -> (i32, i32) {
    %c0_i32 = arith.constant 0 : i32
    %c0_i32_0 = arith.constant 0 : i32
    %c0_i32_1 = arith.constant 0 : i32
    return %c0_i32, %c0_i32_0 : i32, i32
  }
  func.func @transform_2(%arg0: i32, %arg1: i32) -> (i32, i32, i32) {
    %c2_i32 = arith.constant 2 : i32
    %0 = arith.cmpi slt, %arg0, %c2_i32 : i32
    %c2_i32_0 = arith.constant 2 : i32
    %1 = arith.subi %arg0, %c2_i32_0 : i32
    %c1_i32 = arith.constant 1 : i32
    %2 = arith.addi %1, %c1_i32 : i32
    %c0_i32 = arith.constant 0 : i32
    %3 = arith.select %0, %c0_i32, %2 : i32
    %c0_i32_1 = arith.constant 0 : i32
    %c0_i32_2 = arith.constant 0 : i32
    %c0_i32_3 = arith.constant 0 : i32
    return %3, %c0_i32_1, %c0_i32_2 : i32, i32, i32
  }
  func.func @transform_3(%arg0: i32, %arg1: i32) -> (i32, i32, i32) {
    %c0_i32 = arith.constant 0 : i32
    %c0_i32_0 = arith.constant 0 : i32
    %c0_i32_1 = arith.constant 0 : i32
    return %arg0, %c0_i32, %c0_i32_0 : i32, i32, i32
  }
  func.func @transform_4(%arg0: i32, %arg1: i32) -> (i32, i32) {
    %c0_i32 = arith.constant 0 : i32
    %c0_i32_0 = arith.constant 0 : i32
    %c0_i32_1 = arith.constant 0 : i32
    return %c0_i32, %c0_i32_0 : i32, i32
  }
  func.func @transform_5(%arg0: i32, %arg1: i32) -> (i32, i32) {
    %c0_i32 = arith.constant 0 : i32
    %c0_i32_0 = arith.constant 0 : i32
    %c0_i32_1 = arith.constant 0 : i32
    return %c0_i32, %c0_i32_0 : i32, i32
  }
}

</mosaic_0001>

<bundles_post_ra>
// kernel: tpu_custom_call.1
= control target key start
LH: loop header
LB: loop body
LE: loop exit
PB: predicated region body
PF: predicated region fallthrough
CT: control target
= control target key end

     0   :  { %s1964_s0 = inlined_call_operand.hbm [shape: bf16[32,32], index: 0, kind: input, shape index: {}]   ;;  %s1965_s1 = inlined_call_operand.hbm [shape: f32[32,128], index: 1, kind: input, shape index: {}]   ;;  %s1966_s2 = inlined_call_operand.hbm [shape: f32[4,128,128], index: 2, kind: input, shape index: {}]   ;;  %s1967_s3 = inlined_call_operand.vmem [shape: f32[5,1,128], index: 3, kind: input, shape index: {}]   ;;  %s1968_s4 = inlined_call_operand.hbm [shape: f32[408,128], index: 4, kind: input, shape index: {}]   ;;  %s1969_s5 = inlined_call_operand.hbm [shape: f32[2,3], index: 5, kind: output, shape index: {}]  }
   0x1   :  { %1975 = sst [smem:[#allocation17_spill]] %s1964_s0 }
   0x2   :  { %10 = vsyncpa [#allocation5], 0 }
   0x3   :  { %11 = vsyncpa [#allocation8], 0 }
   0x4   :  { %12 = vsyncpa [#allocation6], 0  ;;  %s1656_s18 = smov 0   ;;  %s1658_s19 = smov 0  }
   0x5   :  { %s1660_s20 = smov 0   ;;  %s1662_s21 = smov 0  }
   0x6   :  { %s1664_s22 = smov 0   ;;  %s1666_s23 = smov 0  }
   0x7 LB: > { %s1685_s24 = sadd.s32 4294967295, %s1611_s23   ;;  %p92_p0 = scmp.ne.s32.totalorder %s1599_s20, %s1595_s19  ;;  %s1611_s23 = sphi %s1666_s23, %s18_s23   ;;  %s1607_s22 = sphi %s1664_s22, %s1996_s22   ;;  %s1603_s21 = sphi %s1662_s21, %s1995_s21   ;;  %s1599_s20 = sphi %s1660_s20, %s1994_s20   ;;  %s1595_s19 = sphi %s1658_s19, %s1993_s19   ;;  %s1591_s18 = sphi %s1656_s18, %s1992_s18  }
   0x8   : > { %p93_p1 = scmp.eq.s32.totalorder %s1611_s23, 0  ;;  %p98_p2 = scmp.ne.s32.totalorder %s1595_s19, %s1591_s18 }
   0x9   : > { %p1970_p3 = scmp.eq.s32.totalorder %s1685_s24, 0  ;;  %p940_p4 = scmp.ge.s32.totalorder %s1611_s23, 1 }
   0xa   : > { %p94_p5 = por %p93_p1, %p92_p0  ;;  %p177_p6 = scmp.lt.s32.totalorder %s1611_s23, 6 }
   0xb   : > { %p1696_p7 = por %p1970_p3, %p98_p2  ;;  %s1613_s27 = smov [#allocation4]  }
   0xc   : > { %p1700_p8 = pnand %p940_p4, %p177_p6  ;;  %s189_s28 = sshll.u32 %s1613_s27, 4  ;;  %s190_s28 = int_to_ptr.vmem [resolvable:$true] %s189_s28 }
   0xd   : > { %s1976_s25 = scalar_select %p1696_p7, 1, 0 }
   0xe   : > { %s1977_s26 = scalar_select %p1700_p8, 1, 0 }
   0xf   : > { %p1320_p9 = pneg %p1700_p8  ;;  %p1337_p11 = scmp.lt.s32.totalorder %s1611_s23, 5 }
  0x10   : > { %s1980_s0 = sld [smem:[#allocation17_spill]] }
  0x11   : > { %p1708_p10 = pnand %p1320_p9, %p1970_p3  ;;  %p1713_p12 = pnand %p1337_p11, %p94_p5 }
  0x13   : > { %s1979_s30 = scalar_select %p1713_p12, 1, 0 }
  0x14   : > { %p1725_p0 = pneg %p1708_p10 }
  0x16   : > { %s1405_s8 = scalar_lea.hbm %s1980_s0, 256 }
  0x17   : > { %p1406_p13 = scmp.ne.s32.totalorder %s1980_s0, %s1405_s8  ;;  %p1412_p4 = scmp.lt.u32.totalorder %s1405_s8, %s1980_s0 }
  0x19   : > { %p1408_p1 = pnand %p1725_p0, %p1406_p13 }
  0x1b   : > { %p1409_p2 = pneg %p1408_p1 }
  0x1d   : > { %p1414_p5 = pnand %p1412_p4, %p1409_p2 }
  0x1f   : > { %1417 = shalt.err (!%p1414_p5)
}
  0x20   : > { %s1418_s14 = scalar_lea.vmem %s190_s28, 256  ;;  %p1426_p3 = scmp.lt.s32.totalorder %s190_s28, %s190_s28 }
  0x21   : > { %p1419_p6 = scmp.ne.s32.totalorder %s190_s28, %s1418_s14  ;;  %p1427_p7 = scmp.lt.s32.totalorder %s1418_s14, %s1418_s14 }
  0x23   : > { %p1421_p9 = pnand %p1419_p6, %p1725_p0  ;;  %p1428_p8 = por %p1427_p7, %p1426_p3 }
  0x25   : > { %p1422_p11 = pneg %p1421_p9 }
  0x27   : > { %p1429_p12 = pnand %p1428_p8, %p1422_p11 }
  0x29   : > { %1432 = shalt.err (!%p1429_p12)
}
  0x2a   : > { %s1614_s15 = smov 64   ;;  %s1615_s16 = smov 4  }
  0x2b   : > { %1323 = dma.hbm_to_vmem [thread:$0]  (!%p1708_p10), %s1980_s0, 256, %s190_s28, [#allocation5], %s1614_s15, %s1614_s15, %s1615_s16  }
  0x2c   : > { %s1616_s27 = smov [#allocation7]   ;;  %s1433_s9 = scalar_lea.hbm %s1965_s1, 512 }
  0x2d   : > { %s202_s6 = sshll.u32 %s1616_s27, 4  ;;  %p1434_p3 = scmp.ne.s32.totalorder %s1965_s1, %s1433_s9  ;;  %s203_s6 = int_to_ptr.vmem [resolvable:$true] %s202_s6 }
  0x2e   : > { %p1440_p12 = scmp.lt.u32.totalorder %s1433_s9, %s1965_s1 }
  0x2f   : > { %p1436_p7 = pnand %p1434_p3, %p1725_p0 }
  0x31   : > { %p1437_p8 = pneg %p1436_p7 }
  0x33   : > { %p1442_p13 = pnand %p1440_p12, %p1437_p8 }
  0x35   : > { %1445 = shalt.err (!%p1442_p13)
}
  0x36   : > { %s1446_s28 = scalar_lea.vmem %s203_s6, 512  ;;  %p1454_p5 = scmp.lt.s32.totalorder %s203_s6, %s203_s6 }
  0x37   : > { %p1447_p1 = scmp.ne.s32.totalorder %s203_s6, %s1446_s28  ;;  %p1455_p6 = scmp.lt.s32.totalorder %s1446_s28, %s1446_s28 }
  0x39   : > { %p1449_p2 = pnand %p1447_p1, %p1725_p0  ;;  %p1456_p9 = por %p1455_p6, %p1454_p5 }
  0x3b   : > { %p1450_p4 = pneg %p1449_p2 }
  0x3d   : > { %p1457_p11 = pnand %p1456_p9, %p1450_p4 }
  0x3f   : > { %1460 = shalt.err (!%p1457_p11)
}
  0x40   : > { %s1974_s15 = smov 128   ;;  %s1618_s16 = smov 8  }
  0x41   : > { %1326 = dma.hbm_to_vmem [thread:$0]  (!%p1708_p10), %s1965_s1, 512, %s203_s6, [#allocation8], %s1974_s15, %s1974_s15, %s1618_s16  }
  0x42   : > { %s1619_s27 = smov [#allocation10]   ;;  %s30_s8 = sadd.s32 1, %s1607_s22 }
  0x43   : > { %s215_s7 = sshll.u32 %s1619_s27, 4  ;;  %s1461_s12 = scalar_lea.hbm %s1968_s4, 6528  ;;  %s216_s7 = int_to_ptr.vmem [resolvable:$true] %s215_s7 }
  0x44   : > { %p1462_p3 = scmp.ne.s32.totalorder %s1968_s4, %s1461_s12  ;;  %p1468_p12 = scmp.lt.u32.totalorder %s1461_s12, %s1968_s4 }
  0x46   : > { %p1464_p7 = pnand %p1462_p3, %p1725_p0 }
  0x48   : > { %p1465_p8 = pneg %p1464_p7 }
  0x4a   : > { %p1470_p13 = pnand %p1468_p12, %p1465_p8 }
  0x4c   : > { %1473 = shalt.err (!%p1470_p13)
}
  0x4d   : > { %s1474_s6 = scalar_lea.vmem %s216_s7, 6528  ;;  %p1482_p5 = scmp.lt.s32.totalorder %s216_s7, %s216_s7 }
  0x4e   : > { %p1475_p1 = scmp.ne.s32.totalorder %s216_s7, %s1474_s6  ;;  %p1483_p6 = scmp.lt.s32.totalorder %s1474_s6, %s1474_s6 }
  0x50   : > { %p1477_p2 = pnand %p1475_p1, %p1725_p0  ;;  %p1484_p9 = por %p1483_p6, %p1482_p5 }
  0x52   : > { %p1478_p4 = pneg %p1477_p2 }
  0x54   : > { %p1485_p11 = pnand %p1484_p9, %p1478_p4 }
  0x56   : > { %1488 = shalt.err (!%p1485_p11)
}
  0x57   : > { %1329 = dma.hbm_to_vmem [thread:$0]  (!%p1708_p10), %s1968_s4, 6528, %s216_s7, [#allocation8], %s1974_s15, %s1974_s15, %s1618_s16  }
  0x58   : > { %p32_p0 = scmp.ge.s32.totalorder %s30_s8, 5  ;;  %p76_p3 = scmp.lt.s32.totalorder %s1607_s22, 2 }
  0x59   : > { %s77_s11 = sadd.s32 4294967295, %s1607_s22  ;;  %s85_s18 = sadd.s32 1, %s1599_s20 }
  0x5a   : > { %s1998_s8 = smov (%p32_p0, %s30_s8), 0  ;;  %s2000_s11 = smov (%p76_p3, %s77_s11), 0 }
  0x5b   : > { %p79_p7 = scmp.lt.s32.totalorder %s1998_s8, 2  ;;  %s80_s29 = sadd.s32 4294967295, %s1998_s8 }
  0x5c   : > { %s229_s27 = sand.u32 1, %s1611_s23   ;;  %s231_s9 = sand.u32 1, %s1599_s20  }
  0x5d   : > { %s2002_s29 = smov (%p79_p7, %s80_s29), 0  ;;  %s945_s10 = sshll.u32 %s231_s9, 7 }
  0x5e   : > { %s82_s12 = ssub.s32 %s2000_s11, %s2002_s29  ;;  %s968_s7 = sshll.u32 %s2000_s11, 11 }
  0x5f   : > { %p83_p10 = scmp.eq.s32.totalorder %s82_s12, 0  ;;  %s1796_s28 = scalar_lea.hbm %s1966_s2, %s968_s7 }
  0x60   : > { %s233_s6 = scalar_lea.vmem [#allocation9], %s945_s10  ;;  %s1803_s15 = scalar_lea.sflag [#allocation5], %s229_s27 }
  0x61   : > { %s243_s0 = sshll.u32 %s233_s6, 4  ;;  %s1489_s29 = scalar_lea.hbm %s1796_s28, 2048  ;;  %s1801_s0 = int_to_ptr.vmem [resolvable:$true] %s243_s0 }
  0x62   : > { %s1799_s17 = scalar_select %p83_p10, %s1599_s20, %s85_s18  }
  0x63   : > { %p1490_p8 = scmp.ne.s32.totalorder %s1796_s28, %s1489_s29  ;;  %p1982_p12 = scmp.ne.s32.totalorder %s1979_s30, 0 }
  0x64   : > { %s1494_s12 = scalar_lea.hbm %s1966_s2, 8192  ;;  %p1495_p4 = scmp.lt.u32.totalorder %s1796_s28, %s1966_s2 }
  0x65   : > { %p1491_p13 = pneg %p1982_p12  ;;  %p1496_p5 = scmp.lt.u32.totalorder %s1494_s12, %s1489_s29 }
  0x66   : > { %p1498_p9 = scmp.lt.u32.totalorder %s1489_s29, %s1796_s28 }
  0x67   : > { %p1492_p1 = pnand %p1491_p13, %p1490_p8  ;;  %p1497_p6 = por %p1496_p5, %p1495_p4 }
  0x69   : > { %p1493_p2 = pneg %p1492_p1  ;;  %p1499_p11 = por %p1498_p9, %p1497_p6 }
  0x6b   : > { %p1500_p0 = pnand %p1499_p11, %p1493_p2 }
  0x6d   : > { %1503 = shalt.err (!%p1500_p0)
}
  0x6e   : > { %s1504_s18 = scalar_lea.vmem %s1801_s0, 2048  ;;  %s1620_s27 = smov [#allocation9]  }
  0x6f   : > { %p1505_p3 = scmp.ne.s32.totalorder %s1801_s0, %s1504_s18  ;;  %s1509_s13 = sshll.u32 %s1620_s27, 4  ;;  %s1510_s13 = int_to_ptr.vmem [resolvable:$false] %s1509_s13 }
  0x70   : > { %s1511_s14 = scalar_lea.vmem %s1510_s13, 4096  ;;  %p1512_p8 = scmp.lt.s32.totalorder %s1801_s0, %s1510_s13 }
  0x71   : > { %p1507_p7 = pnand %p1505_p3, %p1491_p13  ;;  %p1513_p1 = scmp.lt.s32.totalorder %s1511_s14, %s1504_s18 }
  0x73   : > { %p1508_p10 = pneg %p1507_p7  ;;  %p1514_p4 = por %p1513_p1, %p1512_p8 }
  0x75   : > { %p1515_p5 = pnand %p1514_p4, %p1508_p10 }
  0x77   : > { %1518 = shalt.err (!%p1515_p5)
}
  0x78   : > { %s1983_s6 = smov 128   ;;  %p1984_p13 = scmp.ne.s32.totalorder %s1977_s26, 0 }
  0x79   : > { %1333 = dma.hbm_to_vmem [thread:$0]  (!%p1982_p12), %s1796_s28, 2048, %s1801_s0, %s1803_s15, %s1983_s6, %s1983_s6, %s1618_s16  }
  0x7a   : > { %261 = sbr.rel (%p1984_p13) target bundleno = 1302 (0x516), region = 40  ;;  %p1985_p2 = scmp.eq.s32.totalorder (!%p1984_p13), %s1685_s24, 0 }
  0x81   : > { %1570 = dma.done.wait (%p1985_p2), [#allocation5], 256   ;;  %p1986_p6 = pmov %p1985_p2 }
  0x82   : > { %p1987_p9 = pmov %p1985_p2 }
  0x83   : > { %1572 = vsyncadd (%p1986_p6), [#allocation5], 4294967040 }
  0x84   : > { %1574 = dma.done.wait (%p1987_p9), [#allocation8], 512   ;;  %p1988_p11 = pmov %p1985_p2 }
  0x85   : > { %s271_s30 = sand.u32 1, %s1685_s24   ;;  %s273_s15 = sand.u32 1, %s1595_s19  }
  0x86   : > { %1576 = vsyncadd (%p1988_p11), [#allocation8], 4294966784  ;;  %s951_s16 = sshll.u32 %s273_s15, 7  ;;  %s272_s26 = scalar_lea.sflag [#allocation5], %s271_s30 }
  0x87   : > { %s1846_s28 = scalar_lea.vmem [#allocation9], %s951_s16  ;;  %p1989_p12 = scmp.ne.s32.totalorder %s1976_s25, 0 }
  0x89   : > { %1578 = dma.done.wait (%p1989_p12), %s272_s26, 2048  }
  0x8a   : > { %1580 = vsyncadd (%p1989_p12), %s272_s26, 4294965248  ;;  %p1990_p0 = pmov %p1985_p2 }
  0x8c   : > { %1582 = dma.done.wait (%p1990_p0), [#allocation8], 6528   ;;  %p1991_p3 = pmov %p1990_p0 }
  0x8d   : > { %p307_p7 = scmp.lt.s32.totalorder %s1603_s21, 4  ;;  %p311_p10 = scmp.eq.s32.totalorder %s1603_s21, 0 }
  0x8e   : > { %1584 = vsyncadd (%p1991_p3), [#allocation8], 4294960768  ;;  %vm317_vm0 = vcmask (%p311_p10), 17408   ;;  %v319_v0 = vld [vmem:[#allocation7] sm:$0xff] (%p311_p10)  ;;  %v320_v1 = vld [vmem:[#allocation7 + $0x8] sm:$0xff] (%p311_p10)  ;;  %v1621_v3 = vmov (%p311_p10), 0.0  }
  0x8f   : > { %s1859_s0 = scalar_select %p307_p7, %s1603_s21, 4 }
  0x90   : > { %316 = sbr.rel (!%p311_p10) target bundleno = 151 (0x97), region = 60  ;;  %v321_v2 = vld [vmem:[#allocation7 + $0x10] sm:$0xff] (%p311_p10)  ;;  %318 = vst.msk [vmem:[#allocation11] sm:$0x3] (%p311_p10), %vm317_vm0, %v1621_v3  ;;  %v323_v4 = vpack.c.bf16 (%p311_p10), %v320_v1, %v319_v0  ;;  %v322_v5 = vld [vmem:[#allocation7 + $0x18] sm:$0xff] (%p311_p10) }
  0x91   : > { %s309_s9 = scalar_lea.vmem %s1967_s3, %s1859_s0  ;;  %v324_v6 = vpack.c.bf16 (%p311_p10), %v322_v5, %v321_v2 }
  0x92   : > { %325 = vst [vmem:[#allocation3] sm:$0xff] (%p311_p10), %v323_v4 }
  0x93   : > { %326 = vst [vmem:[#allocation3 + $0x8] sm:$0xff] (%p311_p10), %v324_v6 }
  0x97 PF: > { %p327_p8 = scmp.gt.s32.totalorder %s1603_s21, 0 }
  0x98   : > { %v332_v7 = vld [vmem:[#allocation2] sm:$0xff] (%p327_p8)  ;;  %v333_v8 = vld [vmem:[#allocation2 + $0x8] sm:$0xff] (%p327_p8)  ;;  %v334_v9 = vld [vmem:[#allocation2 + $0x10] sm:$0xff] (%p327_p8) }
  0x99   : > { %331 = sbr.rel (!%p327_p8) target bundleno = 160 (0xa0), region = 64  ;;  %v336_v10 = vpack.c.bf16 (%p327_p8), %v333_v8, %v332_v7  ;;  %v335_v11 = vld [vmem:[#allocation2 + $0x18] sm:$0xff] (%p327_p8) }
  0x9a   : > { %v337_v12 = vpack.c.bf16 (%p327_p8), %v335_v11, %v334_v9 }
  0x9b   : > { %338 = vst [vmem:[#allocation3] sm:$0xff] (%p327_p8), %v336_v10 }
  0x9c   : > { %339 = vst [vmem:[#allocation3 + $0x8] sm:$0xff] (%p327_p8), %v337_v12 }
  0xa0 PF: > { %vm356_vm1 = vcmask 261120   ;;  %v1403_v15 = vld [vmem:[#allocation4] sm:$0xff]   ;;  %v412_v16 = vld [vmem:[%s1846_s28] sm:$0xff]  ;;  %v413_v17 = vld [vmem:[%s1846_s28 + $0x8] sm:$0xff]  ;;  %p531_p1 = scmp.eq.s32.totalorder %s1603_s21, 4  ;;  %p520_p4 = scmp.ge.s32.totalorder %s1603_s21, 1 }
  0xa1   : > { %1051 = vmatprep.mubr.msk.bf16.mxu0 %vm356_vm1, %v1403_v15  ;;  %v414_v18 = vld [vmem:[%s1846_s28 + $0x10] sm:$0xff]  ;;  %v415_v19 = vld [vmem:[%s1846_s28 + $0x18] sm:$0xff]  ;;  %v1198_v20 = vpack.c.bf16 %v413_v17, %v412_v16  ;;  %v416_v23 = vld [vmem:[%s1846_s28 + $0x20] sm:$0xff]  ;;  %v1622_v62 = vmov (%p531_p1), 0.0|0.0   ;;  %vm1623_vm2 = vmmov (%p531_p1), 0   ;;  %v1624_v1 = vmov (%p531_p1), 0.0  }
  0xa2   : > { %v344_v13 = vld [vmem:[#allocation3] sm:$0xff]  ;;  %v1202_v21 = vpack.c.bf16 %v415_v19, %v414_v18  ;;  %v1404_v22 = vld [vmem:[#allocation4 + $0x8] sm:$0xff]   ;;  %v417_v24 = vld [vmem:[%s1846_s28 + $0x28] sm:$0xff]  ;;  %s521_s25 = scalar_select %p520_p4, 0.0, -inf }
  0xa3   : > { %v345_v14 = vld [vmem:[#allocation3 + $0x8] sm:$0xff]  ;;  %1047 = vmatprep.subr.bf16.mxu0 %v344_v13  ;;  %1199 = vmatprep.subr.bf16.mxu1 %v1198_v20  ;;  %v1206_v25 = vpack.c.bf16 %v417_v24, %v416_v23  ;;  %v418_v26 = vld [vmem:[%s1846_s28 + $0x30] sm:$0xff]  ;;  %v419_v27 = vld [vmem:[%s1846_s28 + $0x38] sm:$0xff]  ;;  %vm611_vm3 = vcmask (%p531_p1), 1041409   ;;  %vm834_vm4 = vcmask (%p531_p1), 17408  }
  0xa4   : > { %1048 = vmatpush3.bf16.msra.mxu0 %v344_v13  ;;  %1201 = vmatpush3.bf16.msra.mxu1 %v1198_v20  ;;  %v1210_v28 = vpack.c.bf16 %v419_v27, %v418_v26  ;;  %v420_v29 = vld [vmem:[%s1846_s28 + $0x40] sm:$0xff]  ;;  %v421_v30 = vld [vmem:[%s1846_s28 + $0x48] sm:$0xff]  ;;  %v422_v32 = vld [vmem:[%s1846_s28 + $0x50] sm:$0xff]  ;;  %v522_v47 = vstv %s521_s25 }
  0xa5   : > { %1049 = vmatprep.subr.bf16.mxu0 %v345_v14  ;;  %1203 = vmatprep.subr.bf16.mxu1 %v1202_v21  ;;  %v1214_v31 = vpack.c.bf16 %v421_v30, %v420_v29  ;;  %v423_v33 = vld [vmem:[%s1846_s28 + $0x58] sm:$0xff]  ;;  %v424_v35 = vld [vmem:[%s1846_s28 + $0x60] sm:$0xff]  ;;  %v425_v36 = vld [vmem:[%s1846_s28 + $0x68] sm:$0xff] }
  0xa6   : > { %v1218_v34 = vpack.c.bf16 %v423_v33, %v422_v32  ;;  %v1222_v37 = vpack.c.bf16 %v425_v36, %v424_v35  ;;  %v426_v38 = vld [vmem:[%s1846_s28 + $0x70] sm:$0xff]  ;;  %v427_v39 = vld [vmem:[%s1846_s28 + $0x78] sm:$0xff]  ;;  %v959_v45 = vld [vmem:[%s309_s9] ss:$0 sm:$0xff] }
  0xa7   : > { %v1226_v40 = vpack.c.bf16 %v427_v39, %v426_v38  ;;  %v554_v59 = vld [vmem:[#allocation10] sm:$0xff] (%p531_p1)  ;;  %v555_v60 = vld [vmem:[#allocation10 + $0x8] sm:$0xff] (%p531_p1)  ;;  %v556_v61 = vld [vmem:[#allocation10 + $0x10] sm:$0xff] (%p531_p1) }
  0xa8   : > { %1050 = vmatpush3.bf16.msra.mxu0 %v345_v14  ;;  %1205 = vmatpush3.bf16.msra.mxu1 %v1202_v21  ;;  %v1231_v63 = vpack.c.bf16 (%p531_p1), %v555_v60, %v554_v59  ;;  %v557_v0 = vld [vmem:[#allocation10 + $0x18] sm:$0xff] (%p531_p1)  ;;  %v558_v3 = vld [vmem:[#allocation10 + $0x20] sm:$0xff] (%p531_p1)  ;;  %v559_v4 = vld [vmem:[#allocation10 + $0x28] sm:$0xff] (%p531_p1) }
  0xa9   : > { %1207 = vmatprep.subr.bf16.mxu1 %v1206_v25  ;;  %1230 = vmatprep.subr.bf16.mxu0 (%p531_p1), %v1622_v62  ;;  %v1234_v2 = vpack.c.bf16 (%p531_p1), %v557_v0, %v556_v61  ;;  %v570_v10 = vld [vmem:[#allocation10 + $0x80] sm:$0xff] (%p531_p1)  ;;  %v1237_v11 = vpack.c.bf16 (%p531_p1), %v559_v4, %v558_v3  ;;  %v571_v13 = vld [vmem:[#allocation10 + $0x88] sm:$0xff] (%p531_p1)  ;;  %v572_v14 = vld [vmem:[#allocation10 + $0x90] sm:$0xff] (%p531_p1) }
  0xaa   : > { %v573_v15 = vld [vmem:[#allocation10 + $0x98] sm:$0xff] (%p531_p1)  ;;  %v560_v16 = vld [vmem:[#allocation10 + $0x30] sm:$0xff] (%p531_p1)  ;;  %v1255_v19 = vpack.c.bf16 (%p531_p1), %v571_v13, %v570_v10  ;;  %v575_v26 = vld [vmem:[#allocation10 + $0xa8] sm:$0xff] (%p531_p1) }
  0xab   : > { %1052 = vmatmul.mubr.msk.bf16.vlgmr.msra.gmra.mrb[0].mxu0 %vm356_vm1, %v1404_v22  ;;  %v561_v17 = vld [vmem:[#allocation10 + $0x38] sm:$0xff] (%p531_p1)  ;;  %v1258_v21 = vpack.c.bf16 (%p531_p1), %v573_v15, %v572_v14  ;;  %v562_v27 = vld [vmem:[#allocation10 + $0x40] sm:$0xff] (%p531_p1)  ;;  %v576_v33 = vld [vmem:[#allocation10 + $0xb0] sm:$0xff] (%p531_p1) }
  0xac   : > { %1209 = vmatpush3.bf16.msra.mxu1 %v1206_v25  ;;  %1125 = vmatprep.mubr.msk.f32.mxu0 (%p531_p1), %vm1623_vm2, %v1624_v1  ;;  %v1240_v22 = vpack.c.bf16 (%p531_p1), %v561_v17, %v560_v16  ;;  %v574_v25 = vld [vmem:[#allocation10 + $0xa0] sm:$0xff] (%p531_p1)  ;;  %v564_v35 = vld [vmem:[#allocation10 + $0x50] sm:$0xff] (%p531_p1)  ;;  %v565_v36 = vld [vmem:[#allocation10 + $0x58] sm:$0xff] (%p531_p1) }
  0xad   : > { %1211 = vmatprep.subr.bf16.mxu1 %v1210_v28  ;;  %1232 = vmatpush3.bf16.msra.mxu0 (%p531_p1), %v1231_v63  ;;  %v1261_v29 = vpack.c.bf16 (%p531_p1), %v575_v26, %v574_v25  ;;  %v1246_v38 = vpack.c.bf16 (%p531_p1), %v565_v36, %v564_v35  ;;  %v584_v61 = vld [vmem:[#allocation10 + $0xf0] sm:$0xff] (%p531_p1)  ;;  %v585_v63 = vld [vmem:[#allocation10 + $0xf8] sm:$0xff] (%p531_p1)  ;;  %v587_v3 = vld [vmem:[#allocation10 + $0x108] sm:$0xff] (%p531_p1) }
  0xae   : > { %1233 = vmatprep.subr.bf16.mxu0 (%p531_p1), %v1622_v62  ;;  %v1276_v0 = vpack.c.bf16 (%p531_p1), %v585_v63, %v584_v61  ;;  %v588_v4 = vld [vmem:[#allocation10 + $0x110] sm:$0xff] (%p531_p1)  ;;  %v594_v13 = vld [vmem:[#allocation10 + $0x140] sm:$0xff] (%p531_p1)  ;;  %v595_v14 = vld [vmem:[#allocation10 + $0x148] sm:$0xff] (%p531_p1) }
  0xaf   : > { %v1291_v15 = vpack.c.bf16 (%p531_p1), %v595_v14, %v594_v13  ;;  %v596_v16 = vld [vmem:[#allocation10 + $0x150] sm:$0xff] (%p531_p1)  ;;  %v597_v17 = vld [vmem:[#allocation10 + $0x158] sm:$0xff] (%p531_p1) }
  0xb0   : > { %1213 = vmatpush3.bf16.msra.mxu1 %v1210_v28  ;;  %v563_v28 = vld [vmem:[#allocation10 + $0x48] sm:$0xff] (%p531_p1)  ;;  %v963_v35 = vld [vmem:[#allocation10 + $0x190] ss:$0 sm:$0xff] (%p531_p1) }
  0xb1   : > { %1215 = vmatprep.subr.bf16.mxu1 %v1214_v31  ;;  %1235 = vmatpush3.bf16.msra.mxu0 (%p531_p1), %v1234_v2  ;;  %v1243_v30 = vpack.c.bf16 (%p531_p1), %v563_v28, %v562_v27  ;;  %v586_v2 = vld [vmem:[#allocation10 + $0x100] sm:$0xff] (%p531_p1)  ;;  %v600_v27 = vld [vmem:[#allocation10 + $0x170] sm:$0xff] (%p531_p1)  ;;  %v601_v28 = vld [vmem:[#allocation10 + $0x178] sm:$0xff] (%p531_p1) }
  0xb2   : > { %1236 = vmatprep.subr.bf16.mxu0 (%p531_p1), %v1622_v62 }
  0xb4   : > { %1217 = vmatpush3.bf16.msra.mxu1 %v1214_v31 }
  0xb5   : > { %1219 = vmatprep.subr.bf16.mxu1 %v1218_v34  ;;  %1238 = vmatpush3.bf16.msra.mxu0 (%p531_p1), %v1237_v11  ;;  %v593_v11 = vld [vmem:[#allocation10 + $0x138] sm:$0xff] (%p531_p1) }
  0xb6   : > { %1239 = vmatprep.subr.bf16.mxu0 (%p531_p1), %v1622_v62 }
  0xb8   : > { %1221 = vmatpush3.bf16.msra.mxu1 %v1218_v34  ;;  %v577_v34 = vld [vmem:[#allocation10 + $0xb8] sm:$0xff] (%p531_p1) }
  0xb9   : > { %1223 = vmatprep.subr.bf16.mxu1 %v1222_v37  ;;  %1241 = vmatpush3.bf16.msra.mxu0 (%p531_p1), %v1240_v22  ;;  %v961_v22 = vld [vmem:[#allocation10 + $0x180] ss:$0 sm:$0xff] (%p531_p1) }
  0xba   : > { %1242 = vmatprep.subr.bf16.mxu0 (%p531_p1), %v1622_v62 }
  0xbc   : > { %1225 = vmatpush3.bf16.msra.mxu1 %v1222_v37  ;;  %v1264_v37 = vpack.c.bf16 (%p531_p1), %v577_v34, %v576_v33 }
  0xbd   : > { %1227 = vmatprep.subr.bf16.mxu1 %v1226_v40  ;;  %1244 = vmatpush3.bf16.msra.mxu0 (%p531_p1), %v1243_v30  ;;  %v962_v30 = vld [vmem:[#allocation10 + $0x188] ss:$0 sm:$0xff] (%p531_p1) }
  0xbe   : > { %1245 = vmatprep.subr.bf16.mxu0 (%p531_p1), %v1622_v62 }
  0xc0   : > { %1229 = vmatpush3.bf16.msra.mxu1 %v1226_v40 }
  0xc1   : > { %1254 = vmatprep.subr.bf16.mxu1 (%p531_p1), %v1622_v62  ;;  %1247 = vmatpush3.bf16.msra.mxu0 (%p531_p1), %v1246_v38 }
  0xc2   : > { %1248 = vmatprep.subr.bf16.mxu0 (%p531_p1), %v1622_v62 }
 0x17e   : > { %v1053_v41 = vpop.f32.mrb[0].mxu0 }
 0x17f   : > { %v397_v42 = vpop.f32.mrb[1].mxu0 }
 0x180   : > { %v1054_v43 = vpop.f32.mrb[2].mxu0  ;;  %1087 = vmatprep.mubr.f32.mxu1 %v397_v42  ;;  %v579_v42 = vld [vmem:[#allocation10 + $0xc8] sm:$0xff] (%p531_p1) }
 0x181   : > { %v400_v44 = vpop.f32.mrb[3].mxu0 }
 0x182   : > { %1088 = vmatmul.mubr.f32.vlgmr.msra.gmra.mrb[0].mxu1 %v400_v44  ;;  %v567_v44 = vld [vmem:[#allocation10 + $0x68] sm:$0xff] (%p531_p1) }
 0x183   : > { %1090 = vmatprep.mubr.f32.mxu1 %v1053_v41  ;;  %1256 = vmatpush3.bf16.msra.mxu1 (%p531_p1), %v1255_v19  ;;  %v578_v41 = vld [vmem:[#allocation10 + $0xc0] sm:$0xff] (%p531_p1) }
 0x184   : > { %1257 = vmatprep.subr.bf16.mxu1 (%p531_p1), %v1622_v62  ;;  %v598_v19 = vld [vmem:[#allocation10 + $0x160] sm:$0xff] (%p531_p1) }
 0x186   : > { %1091 = vmatmul.mubr.f32.gmra.mrb[2].mxu1 %v1054_v43  ;;  %v566_v43 = vld [vmem:[#allocation10 + $0x60] sm:$0xff] (%p531_p1) }
 0x187   : > { %1160 = vmatprep.mubr.msk.f32.mxu1 (%p531_p1), %vm1623_vm2, %v1624_v1  ;;  %1259 = vmatpush3.bf16.msra.mxu1 (%p531_p1), %v1258_v21 }
 0x188   : > { %1260 = vmatprep.subr.bf16.mxu1 (%p531_p1), %v1622_v62 }
 0x18b   : > { %1262 = vmatpush3.bf16.msra.mxu1 (%p531_p1), %v1261_v29  ;;  %v1300_v29 = vpack.c.bf16 (%p531_p1), %v601_v28, %v600_v27 }
 0x18c   : > { %1263 = vmatprep.subr.bf16.mxu1 (%p531_p1), %v1622_v62 }
 0x18f   : > { %1265 = vmatpush3.bf16.msra.mxu1 (%p531_p1), %v1264_v37 }
 0x190   : > { %1266 = vmatprep.subr.bf16.mxu1 (%p531_p1), %v1622_v62 }
 0x255   : > { %v1089_v46 = vpop.f32.mrb[0].mxu1 }
 0x256   : > { %v507_v48 = vadd.f32 %v1089_v46, %v959_v45  ;;  %v501_v49 = vpop.f32.mrb[1].mxu1  ;;  %v1249_v46 = vpack.c.bf16 (%p531_p1), %v567_v44, %v566_v43 }
 0x257   : > { %v502_v50 = vadd.f32 %v959_v45, %v501_v49  ;;  %v580_v49 = vld [vmem:[#allocation10 + $0xd0] sm:$0xff] (%p531_p1) }
 0x258   : > { %v524_v51 = vmax.f32 %v507_v48, %v522_v47  ;;  %1250 = vmatpush3.bf16.msra.mxu0 (%p531_p1), %v1249_v46 }
 0x259   : > { %v523_v52 = vmax.f32 %v502_v50, %v522_v47  ;;  %v1092_v53 = vpop.f32.mrb[2].mxu1  ;;  %535 = sbr.rel (!%p531_p1) target bundleno = 1277 (0x4fd), region = 68  ;;  %v581_v50 = vld [vmem:[#allocation10 + $0xd8] sm:$0xff] (%p531_p1)  ;;  %1251 = vmatprep.subr.bf16.mxu0 (%p531_p1), %v1622_v62 }
 0x25a   : > { %528 = vst [vmem:[#allocation2 + $0x8] sm:$0xff] %v524_v51  ;;  %v517_v54 = vadd.f32 %v1092_v53, %v959_v45  ;;  %v511_v55 = vpop.f32.mrb[3].mxu1  ;;  %v568_v51 = vld [vmem:[#allocation10 + $0x70] sm:$0xff] (%p531_p1)  ;;  %v1270_v53 = vpack.c.bf16 (%p531_p1), %v581_v50, %v580_v49 }
 0x25b   : > { %527 = vst [vmem:[#allocation2] sm:$0xff] %v523_v52  ;;  %v512_v56 = vadd.f32 %v959_v45, %v511_v55  ;;  %v1267_v45 = vpack.c.bf16 (%p531_p1), %v579_v42, %v578_v41  ;;  %v569_v52 = vld [vmem:[#allocation10 + $0x78] sm:$0xff] (%p531_p1) }
 0x25c   : > { %v526_v57 = vmax.f32 %v517_v54, %v522_v47  ;;  %v1252_v54 = vpack.c.bf16 (%p531_p1), %v569_v52, %v568_v51 }
 0x25d   : > { %v525_v58 = vmax.f32 %v512_v56, %v522_v47  ;;  %1268 = vmatpush3.bf16.msra.mxu1 (%p531_p1), %v1267_v45 }
 0x25e   : > { %530 = vst [vmem:[#allocation2 + $0x18] sm:$0xff] %v526_v57  ;;  %1269 = vmatprep.subr.bf16.mxu1 (%p531_p1), %v1622_v62  ;;  %v582_v57 = vld [vmem:[#allocation10 + $0xe0] sm:$0xff] (%p531_p1)  ;;  %1253 = vmatpush3.bf16.msra.mxu0 (%p531_p1), %v1252_v54 }
 0x25f   : > { %529 = vst [vmem:[#allocation2 + $0x10] sm:$0xff] %v525_v58  ;;  %v583_v58 = vld [vmem:[#allocation10 + $0xe8] sm:$0xff] (%p531_p1)  ;;  %1278 = vmatprep.subr.bf16.mxu0 (%p531_p1), %v1622_v62 }
 0x260   : > { %v1273_v59 = vpack.c.bf16 %v583_v58, %v582_v57 }
 0x261   : > { %v537_v6 = vld [vmem:[#allocation2 + $0x8] sm:$0xff]  ;;  %1271 = vmatpush3.bf16.msra.mxu1 %v1270_v53 }
 0x262   : > { %v536_v5 = vld [vmem:[#allocation2] sm:$0xff]  ;;  %1272 = vmatprep.subr.bf16.mxu1 %v1622_v62 }
 0x263   : > { %v540_v9 = vadd.f32 %v537_v6, %v536_v5  ;;  %v1279_v5 = vpack.c.bf16 %v587_v3, %v586_v2  ;;  %v589_v6 = vld [vmem:[#allocation10 + $0x118] sm:$0xff] }
 0x265   : > { %v539_v8 = vld [vmem:[#allocation2 + $0x18] sm:$0xff]  ;;  %v541_v18 = vrot.slane %v540_v9, 4  ;;  %1274 = vmatpush3.bf16.msra.mxu1 %v1273_v59 }
 0x266   : > { %v538_v7 = vld [vmem:[#allocation2 + $0x10] sm:$0xff]  ;;  %1275 = vmatprep.subr.bf16.mxu1 %v1622_v62 }
 0x267   : > { %v547_v12 = vadd.f32 %v539_v8, %v538_v7  ;;  %v542_v23 = vadd.f32 %v541_v18, %v540_v9  ;;  %v1282_v7 = vpack.c.bf16 %v589_v6, %v588_v4  ;;  %v590_v8 = vld [vmem:[#allocation10 + $0x120] sm:$0xff]  ;;  %v591_v9 = vld [vmem:[#allocation10 + $0x128] sm:$0xff]  ;;  %v1294_v18 = vpack.c.bf16 %v597_v17, %v596_v16 }
 0x268   : > { %v1285_v10 = vpack.c.bf16 %v591_v9, %v590_v8 }
 0x269   : > { %v548_v20 = vrot.slane %v547_v12, 4  ;;  %v543_v31 = vrot.slane %v542_v23, 2  ;;  %1277 = vmatpush3.bf16.msra.mxu1 %v1276_v0 }
 0x26b   : > { %v549_v24 = vadd.f32 %v548_v20, %v547_v12  ;;  %v544_v39 = vadd.f32 %v543_v31, %v542_v23  ;;  %v599_v20 = vld [vmem:[#allocation10 + $0x168] sm:$0xff] }
 0x26c   : > { %v1297_v21 = vpack.c.bf16 %v599_v20, %v598_v19 }
 0x26d   : > { %v550_v32 = vrot.slane %v549_v24, 2  ;;  %v545_v47 = vrot.slane %v544_v39, 1 }
 0x26f   : > { %v551_v40 = vadd.f32 %v550_v32, %v549_v24  ;;  %v546_v55 = vadd.f32 %v545_v47, %v544_v39 }
 0x271   : > { %v552_v48 = vrot.slane %v551_v40, 1 }
 0x273   : > { %v553_v56 = vadd.f32 %v552_v48, %v551_v40 }
 0x275   : > { %v612_v60 = vsel %vm611_vm3, %v553_v56, %v546_v55 }
 0x276   : > { %1126 = vmatmul.mubr.f32.vlgmr.msra.gmra.mrb[0].mxu0 %v612_v60 }
 0x277   : > { %1195 = vmatprep.mubr.msk.f32.mxu0 %vm1623_vm2, %v1624_v1  ;;  %1280 = vmatpush3.bf16.msra.mxu0 %v1279_v5  ;;  %v592_v1 = vld [vmem:[#allocation10 + $0x130] sm:$0xff] }
 0x278   : > { %1281 = vmatprep.subr.bf16.mxu0 %v1622_v62  ;;  %v1288_v12 = vpack.c.bf16 %v593_v11, %v592_v1 }
 0x27b   : > { %1283 = vmatpush3.bf16.msra.mxu0 %v1282_v7 }
 0x27c   : > { %1284 = vmatprep.subr.bf16.mxu0 %v1622_v62 }
 0x27f   : > { %1286 = vmatpush3.bf16.msra.mxu0 %v1285_v10 }
 0x280   : > { %1287 = vmatprep.subr.bf16.mxu0 %v1622_v62 }
 0x283   : > { %1289 = vmatpush3.bf16.msra.mxu0 %v1288_v12 }
 0x284   : > { %1290 = vmatprep.subr.bf16.mxu0 %v1622_v62 }
 0x287   : > { %1292 = vmatpush3.bf16.msra.mxu0 %v1291_v15 }
 0x288   : > { %1293 = vmatprep.subr.bf16.mxu0 %v1622_v62 }
 0x28b   : > { %1295 = vmatpush3.bf16.msra.mxu0 %v1294_v18 }
 0x28c   : > { %1296 = vmatprep.subr.bf16.mxu0 %v1622_v62 }
 0x28f   : > { %1298 = vmatpush3.bf16.msra.mxu0 %v1297_v21 }
 0x290   : > { %1299 = vmatprep.subr.bf16.mxu0 %v1622_v62 }
 0x293   : > { %1301 = vmatpush3.bf16.msra.mxu0 %v1300_v29 }
 0x349   : > { %v680_v23 = vpop.f32.mrb[0].mxu0 }
 0x34a   : > { %v681_v24 = vadd.f32 %v961_v22, %v680_v23  ;;  %v1127_v25 = vpop.f32.mrb[1].mxu0 }
 0x34c   : > { %v684_v26 = vmax.f32 %v681_v24, 0.0 }
 0x34e   : > { %1161 = vmatmul.mubr.f32.vlgmr.msra.gmra.mrb[0].mxu1 %v684_v26 }
 0x421   : > { %v755_v31 = vpop.f32.mrb[0].mxu1 }
 0x422   : > { %v756_v32 = vadd.f32 %v962_v30, %v755_v31  ;;  %v1162_v33 = vpop.f32.mrb[1].mxu1 }
 0x424   : > { %v759_v34 = vmax.f32 %v756_v32, 0.0 }
 0x426   : > { %1196 = vmatmul.mubr.f32.vlgmr.msra.gmra.mrb[2].mxu0 %v759_v34 }
 0x4f9   : > { %v830_v36 = vpop.f32.mrb[2].mxu0 }
 0x4fa   : > { %v831_v62 = vadd.f32 %v963_v35, %v830_v36  ;;  %v1197_v37 = vpop.f32.mrb[3].mxu0 }
 0x4fc   : > { %835 = vst.msk [vmem:[#allocation11] sm:$0x3] %vm834_vm4, %v831_v62 }
 0x4fd PF: > { %p1341_p5 = scmp.eq.s32.totalorder %s1685_s24, 4  ;;  %s1625_s21 = smov [#allocation11]  }
 0x4fe   : > { %s843_s7 = sshll.u32 %s1625_s21, 4  ;;  %s844_s7 = int_to_ptr.vmem [resolvable:$true] %s843_s7 }
 0x4ff   : > { %s1519_s18 = scalar_lea.vmem %s844_s7, 32  ;;  %p1526_p9 = scmp.lt.s32.totalorder %s844_s7, %s844_s7 }
 0x500   : > { %p1520_p13 = scmp.ne.s32.totalorder %s844_s7, %s1519_s18  ;;  %p1527_p11 = scmp.lt.s32.totalorder %s1519_s18, %s1519_s18 }
 0x502   : > { %p1521_p2 = pnand %p1520_p13, %p1341_p5  ;;  %p1528_p12 = por %p1527_p11, %p1526_p9 }
 0x504   : > { %p1522_p6 = pneg %p1521_p2 }
 0x506   : > { %p1529_p0 = pnand %p1528_p12, %p1522_p6 }
 0x508   : > { %1532 = shalt.err (!%p1529_p0)
}
 0x509   : > { %s1533_s14 = scalar_lea.hbm %s1969_s5, 32 }
 0x50a   : > { %p1534_p3 = scmp.ne.s32.totalorder %s1969_s5, %s1533_s14  ;;  %p1539_p8 = scmp.lt.u32.totalorder %s1533_s14, %s1969_s5 }
 0x50c   : > { %p1535_p7 = pnand %p1534_p3, %p1341_p5 }
 0x50e   : > { %p1536_p10 = pneg %p1535_p7 }
 0x510   : > { %p1541_p1 = pnand %p1539_p8, %p1536_p10 }
 0x512   : > { %1544 = shalt.err (!%p1541_p1)
}
 0x513   : > { %1317 = dma.vmem_to_hbm [thread:$0]  (%p1341_p5), %s844_s7, 32, %s1969_s5, [#allocation6]  }
 0x514   : > { %1586 = dma.done.wait (%p1341_p5), [#allocation6], 32  }
 0x515   : > { %1588 = vsyncadd (%p1341_p5), [#allocation6], 4294967264 }
 0x516 PF: > { %s18_s23 = sadd.s32 1, %s1611_s23   ;;  %s1992_s18 = smov %s1595_s19 }
 0x517   : > { %p15_p4 = scmp.ge.s32.totalorder %s18_s23, 7   ;;  %s1993_s19 = smov %s1599_s20 }
 0x518   : > { %s1994_s20 = smov %s1799_s17  ;;  %s1995_s21 = smov %s1607_s22 }
 0x519   : > { %s1996_s22 = smov %s1998_s8  ;;  %17 = sbr.rel (!%p15_p4) target bundleno = 7 (0x7), region = 103 }
 0x520   :  { %856 = vsyncpa [#allocation5], 1 }
 0x521   :  { %858 = vsyncpa [#allocation5 + $0x1], 1 }
 0x522   :  { %859 = vsyncpa [#allocation8], 1 }
 0x523   :  { %860 = vsyncpa [#allocation6], 1 }
 0x524   :  { %862 = vsyncpa [#allocation6 + $0x1], 1 }

// kernel: tpu_custom_call.1
= control target key start
LH: loop header
LB: loop body
LE: loop exit
PB: predicated region body
PF: predicated region fallthrough
CT: control target
= control target key end

     0   :  { %s1964_s0 = inlined_call_operand.hbm [shape: bf16[32,32], index: 0, kind: input, shape index: {}]   ;;  %s1965_s1 = inlined_call_operand.hbm [shape: f32[32,128], index: 1, kind: input, shape index: {}]   ;;  %s1966_s2 = inlined_call_operand.hbm [shape: f32[4,128,128], index: 2, kind: input, shape index: {}]   ;;  %s1967_s3 = inlined_call_operand.vmem [shape: f32[5,1,128], index: 3, kind: input, shape index: {}]   ;;  %s1968_s4 = inlined_call_operand.hbm [shape: f32[408,128], index: 4, kind: input, shape index: {}]   ;;  %s1969_s5 = inlined_call_operand.hbm [shape: f32[2,3], index: 5, kind: output, shape index: {}]  }
   0x1   :  { %1975 = sst [smem:[#allocation17_spill]] %s1964_s0 }
   0x2   :  { %10 = vsyncpa [#allocation5], 0 }
   0x3   :  { %11 = vsyncpa [#allocation8], 0 }
   0x4   :  { %12 = vsyncpa [#allocation6], 0  ;;  %s1656_s18 = smov 0   ;;  %s1658_s19 = smov 0  }
   0x5   :  { %s1660_s20 = smov 0   ;;  %s1662_s21 = smov 0  }
   0x6   :  { %s1664_s22 = smov 0   ;;  %s1666_s23 = smov 0  }
   0x7 LB: > { %s1685_s24 = sadd.s32 4294967295, %s1611_s23   ;;  %p92_p0 = scmp.ne.s32.totalorder %s1599_s20, %s1595_s19  ;;  %s1611_s23 = sphi %s1666_s23, %s18_s23   ;;  %s1607_s22 = sphi %s1664_s22, %s1996_s22   ;;  %s1603_s21 = sphi %s1662_s21, %s1995_s21   ;;  %s1599_s20 = sphi %s1660_s20, %s1994_s20   ;;  %s1595_s19 = sphi %s1658_s19, %s1993_s19   ;;  %s1591_s18 = sphi %s1656_s18, %s1992_s18  }
   0x8   : > { %p93_p1 = scmp.eq.s32.totalorder %s1611_s23, 0  ;;  %p98_p2 = scmp.ne.s32.totalorder %s1595_s19, %s1591_s18 }
   0x9   : > { %p1970_p3 = scmp.eq.s32.totalorder %s1685_s24, 0  ;;  %p940_p4 = scmp.ge.s32.totalorder %s1611_s23, 1 }
   0xa   : > { %p94_p5 = por %p93_p1, %p92_p0  ;;  %p177_p6 = scmp.lt.s32.totalorder %s1611_s23, 6 }
   0xb   : > { %p1696_p7 = por %p1970_p3, %p98_p2  ;;  %s1613_s27 = smov [#allocation4]  }
   0xc   : > { %p1700_p8 = pnand %p940_p4, %p177_p6  ;;  %s189_s28 = sshll.u32 %s1613_s27, 4  ;;  %s190_s28 = int_to_ptr.vmem [resolvable:$true] %s189_s28 }
   0xd   : > { %s1976_s25 = scalar_select %p1696_p7, 1, 0 }
   0xe   : > { %s1977_s26 = scalar_select %p1700_p8, 1, 0 }
   0xf   : > { %p1320_p9 = pneg %p1700_p8  ;;  %p1337_p11 = scmp.lt.s32.totalorder %s1611_s23, 5 }
  0x10   : > { %s1980_s0 = sld [smem:[#allocation17_spill]] }
  0x11   : > { %p1708_p10 = pnand %p1320_p9, %p1970_p3  ;;  %p1713_p12 = pnand %p1337_p11, %p94_p5 }
  0x13   : > { %s1979_s30 = scalar_select %p1713_p12, 1, 0 }
  0x14   : > { %p1725_p0 = pneg %p1708_p10 }
  0x16   : > { %s1405_s8 = scalar_lea.hbm %s1980_s0, 256 }
  0x17   : > { %p1406_p13 = scmp.ne.s32.totalorder %s1980_s0, %s1405_s8  ;;  %p1412_p4 = scmp.lt.u32.totalorder %s1405_s8, %s1980_s0 }
  0x19   : > { %p1408_p1 = pnand %p1725_p0, %p1406_p13 }
  0x1b   : > { %p1409_p2 = pneg %p1408_p1 }
  0x1d   : > { %p1414_p5 = pnand %p1412_p4, %p1409_p2 }
  0x1f   : > { %1417 = shalt.err (!%p1414_p5)
}
  0x20   : > { %s1418_s14 = scalar_lea.vmem %s190_s28, 256  ;;  %p1426_p3 = scmp.lt.s32.totalorder %s190_s28, %s190_s28 }
  0x21   : > { %p1419_p6 = scmp.ne.s32.totalorder %s190_s28, %s1418_s14  ;;  %p1427_p7 = scmp.lt.s32.totalorder %s1418_s14, %s1418_s14 }
  0x23   : > { %p1421_p9 = pnand %p1419_p6, %p1725_p0  ;;  %p1428_p8 = por %p1427_p7, %p1426_p3 }
  0x25   : > { %p1422_p11 = pneg %p1421_p9 }
  0x27   : > { %p1429_p12 = pnand %p1428_p8, %p1422_p11 }
  0x29   : > { %1432 = shalt.err (!%p1429_p12)
}
  0x2a   : > { %s1614_s15 = smov 64   ;;  %s1615_s16 = smov 4  }
  0x2b   : > { %1323 = dma.hbm_to_vmem [thread:$0]  (!%p1708_p10), %s1980_s0, 256, %s190_s28, [#allocation5], %s1614_s15, %s1614_s15, %s1615_s16  }
  0x2c   : > { %s1616_s27 = smov [#allocation7]   ;;  %s1433_s9 = scalar_lea.hbm %s1965_s1, 512 }
  0x2d   : > { %s202_s6 = sshll.u32 %s1616_s27, 4  ;;  %p1434_p3 = scmp.ne.s32.totalorder %s1965_s1, %s1433_s9  ;;  %s203_s6 = int_to_ptr.vmem [resolvable:$true] %s202_s6 }
  0x2e   : > { %p1440_p12 = scmp.lt.u32.totalorder %s1433_s9, %s1965_s1 }
  0x2f   : > { %p1436_p7 = pnand %p1434_p3, %p1725_p0 }
  0x31   : > { %p1437_p8 = pneg %p1436_p7 }
  0x33   : > { %p1442_p13 = pnand %p1440_p12, %p1437_p8 }
  0x35   : > { %1445 = shalt.err (!%p1442_p13)
}
  0x36   : > { %s1446_s28 = scalar_lea.vmem %s203_s6, 512  ;;  %p1454_p5 = scmp.lt.s32.totalorder %s203_s6, %s203_s6 }
  0x37   : > { %p1447_p1 = scmp.ne.s32.totalorder %s203_s6, %s1446_s28  ;;  %p1455_p6 = scmp.lt.s32.totalorder %s1446_s28, %s1446_s28 }
  0x39   : > { %p1449_p2 = pnand %p1447_p1, %p1725_p0  ;;  %p1456_p9 = por %p1455_p6, %p1454_p5 }
  0x3b   : > { %p1450_p4 = pneg %p1449_p2 }
  0x3d   : > { %p1457_p11 = pnand %p1456_p9, %p1450_p4 }
  0x3f   : > { %1460 = shalt.err (!%p1457_p11)
}
  0x40   : > { %s1974_s15 = smov 128   ;;  %s1618_s16 = smov 8  }
  0x41   : > { %1326 = dma.hbm_to_vmem [thread:$0]  (!%p1708_p10), %s1965_s1, 512, %s203_s6, [#allocation8], %s1974_s15, %s1974_s15, %s1618_s16  }
  0x42   : > { %s1619_s27 = smov [#allocation10]   ;;  %s30_s8 = sadd.s32 1, %s1607_s22 }
  0x43   : > { %s215_s7 = sshll.u32 %s1619_s27, 4  ;;  %s1461_s12 = scalar_lea.hbm %s1968_s4, 6528  ;;  %s216_s7 = int_to_ptr.vmem [resolvable:$true] %s215_s7 }
  0x44   : > { %p1462_p3 = scmp.ne.s32.totalorder %s1968_s4, %s1461_s12  ;;  %p1468_p12 = scmp.lt.u32.totalorder %s1461_s12, %s1968_s4 }
  0x46   : > { %p1464_p7 = pnand %p1462_p3, %p1725_p0 }
  0x48   : > { %p1465_p8 = pneg %p1464_p7 }
  0x4a   : > { %p1470_p13 = pnand %p1468_p12, %p1465_p8 }
  0x4c   : > { %1473 = shalt.err (!%p1470_p13)
}
  0x4d   : > { %s1474_s6 = scalar_lea.vmem %s216_s7, 6528  ;;  %p1482_p5 = scmp.lt.s32.totalorder %s216_s7, %s216_s7 }
  0x4e   : > { %p1475_p1 = scmp.ne.s32.totalorder %s216_s7, %s1474_s6  ;;  %p1483_p6 = scmp.lt.s32.totalorder %s1474_s6, %s1474_s6 }
  0x50   : > { %p1477_p2 = pnand %p1475_p1, %p1725_p0  ;;  %p1484_p9 = por %p1483_p6, %p1482_p5 }
  0x52   : > { %p1478_p4 = pneg %p1477_p2 }
  0x54   : > { %p1485_p11 = pnand %p1484_p9, %p1478_p4 }
  0x56   : > { %1488 = shalt.err (!%p1485_p11)
}
  0x57   : > { %1329 = dma.hbm_to_vmem [thread:$0]  (!%p1708_p10), %s1968_s4, 6528, %s216_s7, [#allocation8], %s1974_s15, %s1974_s15, %s1618_s16  }
  0x58   : > { %p32_p0 = scmp.ge.s32.totalorder %s30_s8, 5  ;;  %p76_p3 = scmp.lt.s32.totalorder %s1607_s22, 2 }
  0x59   : > { %s77_s11 = sadd.s32 4294967295, %s1607_s22  ;;  %s85_s18 = sadd.s32 1, %s1599_s20 }
  0x5a   : > { %s1998_s8 = smov (%p32_p0, %s30_s8), 0  ;;  %s2000_s11 = smov (%p76_p3, %s77_s11), 0 }
  0x5b   : > { %p79_p7 = scmp.lt.s32.totalorder %s1998_s8, 2  ;;  %s80_s29 = sadd.s32 4294967295, %s1998_s8 }
  0x5c   : > { %s229_s27 = sand.u32 1, %s1611_s23   ;;  %s231_s9 = sand.u32 1, %s1599_s20  }
  0x5d   : > { %s2002_s29 = smov (%p79_p7, %s80_s29), 0  ;;  %s945_s10 = sshll.u32 %s231_s9, 7 }
  0x5e   : > { %s82_s12 = ssub.s32 %s2000_s11, %s2002_s29  ;;  %s968_s7 = sshll.u32 %s2000_s11, 11 }
  0x5f   : > { %p83_p10 = scmp.eq.s32.totalorder %s82_s12, 0  ;;  %s1796_s28 = scalar_lea.hbm %s1966_s2, %s968_s7 }
  0x60   : > { %s233_s6 = scalar_lea.vmem [#allocation9], %s945_s10  ;;  %s1803_s15 = scalar_lea.sflag [#allocation5], %s229_s27 }
  0x61   : > { %s243_s0 = sshll.u32 %s233_s6, 4  ;;  %s1489_s29 = scalar_lea.hbm %s1796_s28, 2048  ;;  %s1801_s0 = int_to_ptr.vmem [resolvable:$true] %s243_s0 }
  0x62   : > { %s1799_s17 = scalar_select %p83_p10, %s1599_s20, %s85_s18  }
  0x63   : > { %p1490_p8 = scmp.ne.s32.totalorder %s1796_s28, %s1489_s29  ;;  %p1982_p12 = scmp.ne.s32.totalorder %s1979_s30, 0 }
  0x64   : > { %s1494_s12 = scalar_lea.hbm %s1966_s2, 8192  ;;  %p1495_p4 = scmp.lt.u32.totalorder %s1796_s28, %s1966_s2 }
  0x65   : > { %p1491_p13 = pneg %p1982_p12  ;;  %p1496_p5 = scmp.lt.u32.totalorder %s1494_s12, %s1489_s29 }
  0x66   : > { %p1498_p9 = scmp.lt.u32.totalorder %s1489_s29, %s1796_s28 }
  0x67   : > { %p1492_p1 = pnand %p1491_p13, %p1490_p8  ;;  %p1497_p6 = por %p1496_p5, %p1495_p4 }
  0x69   : > { %p1493_p2 = pneg %p1492_p1  ;;  %p1499_p11 = por %p1498_p9, %p1497_p6 }
  0x6b   : > { %p1500_p0 = pnand %p1499_p11, %p1493_p2 }
  0x6d   : > { %1503 = shalt.err (!%p1500_p0)
}
  0x6e   : > { %s1504_s18 = scalar_lea.vmem %s1801_s0, 2048  ;;  %s1620_s27 = smov [#allocation9]  }
  0x6f   : > { %p1505_p3 = scmp.ne.s32.totalorder %s1801_s0, %s1504_s18  ;;  %s1509_s13 = sshll.u32 %s1620_s27, 4  ;;  %s1510_s13 = int_to_ptr.vmem [resolvable:$false] %s1509_s13 }
  0x70   : > { %s1511_s14 = scalar_lea.vmem %s1510_s13, 4096  ;;  %p1512_p8 = scmp.lt.s32.totalorder %s1801_s0, %s1510_s13 }
  0x71   : > { %p1507_p7 = pnand %p1505_p3, %p1491_p13  ;;  %p1513_p1 = scmp.lt.s32.totalorder %s1511_s14, %s1504_s18 }
  0x73   : > { %p1508_p10 = pneg %p1507_p7  ;;  %p1514_p4 = por %p1513_p1, %p1512_p8 }
  0x75   : > { %p1515_p5 = pnand %p1514_p4, %p1508_p10 }
  0x77   : > { %1518 = shalt.err (!%p1515_p5)
}
  0x78   : > { %s1983_s6 = smov 128   ;;  %p1984_p13 = scmp.ne.s32.totalorder %s1977_s26, 0 }
  0x79   : > { %1333 = dma.hbm_to_vmem [thread:$0]  (!%p1982_p12), %s1796_s28, 2048, %s1801_s0, %s1803_s15, %s1983_s6, %s1983_s6, %s1618_s16  }
  0x7a   : > { %261 = sbr.rel (%p1984_p13) target bundleno = 1302 (0x516), region = 40  ;;  %p1985_p2 = scmp.eq.s32.totalorder (!%p1984_p13), %s1685_s24, 0 }
  0x81   : > { %1570 = dma.done.wait (%p1985_p2), [#allocation5], 256   ;;  %p1986_p6 = pmov %p1985_p2 }
  0x82   : > { %p1987_p9 = pmov %p1985_p2 }
  0x83   : > { %1572 = vsyncadd (%p1986_p6), [#allocation5], 4294967040 }
  0x84   : > { %1574 = dma.done.wait (%p1987_p9), [#allocation8], 512   ;;  %p1988_p11 = pmov %p1985_p2 }
  0x85   : > { %s271_s30 = sand.u32 1, %s1685_s24   ;;  %s273_s15 = sand.u32 1, %s1595_s19  }
  0x86   : > { %1576 = vsyncadd (%p1988_p11), [#allocation8], 4294966784  ;;  %s951_s16 = sshll.u32 %s273_s15, 7  ;;  %s272_s26 = scalar_lea.sflag [#allocation5], %s271_s30 }
  0x87   : > { %s1846_s28 = scalar_lea.vmem [#allocation9], %s951_s16  ;;  %p1989_p12 = scmp.ne.s32.totalorder %s1976_s25, 0 }
  0x89   : > { %1578 = dma.done.wait (%p1989_p12), %s272_s26, 2048  }
  0x8a   : > { %1580 = vsyncadd (%p1989_p12), %s272_s26, 4294965248  ;;  %p1990_p0 = pmov %p1985_p2 }
  0x8c   : > { %1582 = dma.done.wait (%p1990_p0), [#allocation8], 6528   ;;  %p1991_p3 = pmov %p1990_p0 }
  0x8d   : > { %p307_p7 = scmp.lt.s32.totalorder %s1603_s21, 4  ;;  %p311_p10 = scmp.eq.s32.totalorder %s1603_s21, 0 }
  0x8e   : > { %1584 = vsyncadd (%p1991_p3), [#allocation8], 4294960768  ;;  %vm317_vm0 = vcmask (%p311_p10), 17408   ;;  %v319_v0 = vld [vmem:[#allocation7] sm:$0xff] (%p311_p10)  ;;  %v320_v1 = vld [vmem:[#allocation7 + $0x8] sm:$0xff] (%p311_p10)  ;;  %v1621_v3 = vmov (%p311_p10), 0.0  }
  0x8f   : > { %s1859_s0 = scalar_select %p307_p7, %s1603_s21, 4 }
  0x90   : > { %316 = sbr.rel (!%p311_p10) target bundleno = 151 (0x97), region = 60  ;;  %v321_v2 = vld [vmem:[#allocation7 + $0x10] sm:$0xff] (%p311_p10)  ;;  %318 = vst.msk [vmem:[#allocation11] sm:$0x3] (%p311_p10), %vm317_vm0, %v1621_v3  ;;  %v323_v4 = vpack.c.bf16 (%p311_p10), %v320_v1, %v319_v0  ;;  %v322_v5 = vld [vmem:[#allocation7 + $0x18] sm:$0xff] (%p311_p10) }
  0x91   : > { %s309_s9 = scalar_lea.vmem %s1967_s3, %s1859_s0  ;;  %v324_v6 = vpack.c.bf16 (%p311_p10), %v322_v5, %v321_v2 }
  0x92   : > { %325 = vst [vmem:[#allocation3] sm:$0xff] (%p311_p10), %v323_v4 }
  0x93   : > { %326 = vst [vmem:[#allocation3 + $0x8] sm:$0xff] (%p311_p10), %v324_v6 }
  0x97 PF: > { %p327_p8 = scmp.gt.s32.totalorder %s1603_s21, 0 }
  0x98   : > { %v332_v7 = vld [vmem:[#allocation2] sm:$0xff] (%p327_p8)  ;;  %v333_v8 = vld [vmem:[#allocation2 + $0x8] sm:$0xff] (%p327_p8)  ;;  %v334_v9 = vld [vmem:[#allocation2 + $0x10] sm:$0xff] (%p327_p8) }
  0x99   : > { %331 = sbr.rel (!%p327_p8) target bundleno = 160 (0xa0), region = 64  ;;  %v336_v10 = vpack.c.bf16 (%p327_p8), %v333_v8, %v332_v7  ;;  %v335_v11 = vld [vmem:[#allocation2 + $0x18] sm:$0xff] (%p327_p8) }
  0x9a   : > { %v337_v12 = vpack.c.bf16 (%p327_p8), %v335_v11, %v334_v9 }
  0x9b   : > { %338 = vst [vmem:[#allocation3] sm:$0xff] (%p327_p8), %v336_v10 }
  0x9c   : > { %339 = vst [vmem:[#allocation3 + $0x8] sm:$0xff] (%p327_p8), %v337_v12 }
  0xa0 PF: > { %vm356_vm1 = vcmask 261120   ;;  %v1403_v15 = vld [vmem:[#allocation4] sm:$0xff]   ;;  %v412_v16 = vld [vmem:[%s1846_s28] sm:$0xff]  ;;  %v413_v17 = vld [vmem:[%s1846_s28 + $0x8] sm:$0xff]  ;;  %p531_p1 = scmp.eq.s32.totalorder %s1603_s21, 4  ;;  %p520_p4 = scmp.ge.s32.totalorder %s1603_s21, 1 }
  0xa1   : > { %1051 = vmatprep.mubr.msk.bf16.mxu0 %vm356_vm1, %v1403_v15  ;;  %v414_v18 = vld [vmem:[%s1846_s28 + $0x10] sm:$0xff]  ;;  %v415_v19 = vld [vmem:[%s1846_s28 + $0x18] sm:$0xff]  ;;  %v1198_v20 = vpack.c.bf16 %v413_v17, %v412_v16  ;;  %v416_v23 = vld [vmem:[%s1846_s28 + $0x20] sm:$0xff]  ;;  %v1622_v62 = vmov (%p531_p1), 0.0|0.0   ;;  %vm1623_vm2 = vmmov (%p531_p1), 0   ;;  %v1624_v1 = vmov (%p531_p1), 0.0  }
  0xa2   : > { %v344_v13 = vld [vmem:[#allocation3] sm:$0xff]  ;;  %v1202_v21 = vpack.c.bf16 %v415_v19, %v414_v18  ;;  %v1404_v22 = vld [vmem:[#allocation4 + $0x8] sm:$0xff]   ;;  %v417_v24 = vld [vmem:[%s1846_s28 + $0x28] sm:$0xff]  ;;  %s521_s25 = scalar_select %p520_p4, 0.0, -inf }
  0xa3   : > { %v345_v14 = vld [vmem:[#allocation3 + $0x8] sm:$0xff]  ;;  %1047 = vmatprep.subr.bf16.mxu0 %v344_v13  ;;  %1199 = vmatprep.subr.bf16.mxu1 %v1198_v20  ;;  %v1206_v25 = vpack.c.bf16 %v417_v24, %v416_v23  ;;  %v418_v26 = vld [vmem:[%s1846_s28 + $0x30] sm:$0xff]  ;;  %v419_v27 = vld [vmem:[%s1846_s28 + $0x38] sm:$0xff]  ;;  %vm611_vm3 = vcmask (%p531_p1), 1041409   ;;  %vm834_vm4 = vcmask (%p531_p1), 17408  }
  0xa4   : > { %1048 = vmatpush3.bf16.msra.mxu0 %v344_v13  ;;  %1201 = vmatpush3.bf16.msra.mxu1 %v1198_v20  ;;  %v1210_v28 = vpack.c.bf16 %v419_v27, %v418_v26  ;;  %v420_v29 = vld [vmem:[%s1846_s28 + $0x40] sm:$0xff]  ;;  %v421_v30 = vld [vmem:[%s1846_s28 + $0x48] sm:$0xff]  ;;  %v422_v32 = vld [vmem:[%s1846_s28 + $0x50] sm:$0xff]  ;;  %v522_v47 = vstv %s521_s25 }
  0xa5   : > { %1049 = vmatprep.subr.bf16.mxu0 %v345_v14  ;;  %1203 = vmatprep.subr.bf16.mxu1 %v1202_v21  ;;  %v1214_v31 = vpack.c.bf16 %v421_v30, %v420_v29  ;;  %v423_v33 = vld [vmem:[%s1846_s28 + $0x58] sm:$0xff]  ;;  %v424_v35 = vld [vmem:[%s1846_s28 + $0x60] sm:$0xff]  ;;  %v425_v36 = vld [vmem:[%s1846_s28 + $0x68] sm:$0xff] }
  0xa6   : > { %v1218_v34 = vpack.c.bf16 %v423_v33, %v422_v32  ;;  %v1222_v37 = vpack.c.bf16 %v425_v36, %v424_v35  ;;  %v426_v38 = vld [vmem:[%s1846_s28 + $0x70] sm:$0xff]  ;;  %v427_v39 = vld [vmem:[%s1846_s28 + $0x78] sm:$0xff]  ;;  %v959_v45 = vld [vmem:[%s309_s9] ss:$0 sm:$0xff] }
  0xa7   : > { %v1226_v40 = vpack.c.bf16 %v427_v39, %v426_v38  ;;  %v554_v59 = vld [vmem:[#allocation10] sm:$0xff] (%p531_p1)  ;;  %v555_v60 = vld [vmem:[#allocation10 + $0x8] sm:$0xff] (%p531_p1)  ;;  %v556_v61 = vld [vmem:[#allocation10 + $0x10] sm:$0xff] (%p531_p1) }
  0xa8   : > { %1050 = vmatpush3.bf16.msra.mxu0 %v345_v14  ;;  %1205 = vmatpush3.bf16.msra.mxu1 %v1202_v21  ;;  %v1231_v63 = vpack.c.bf16 (%p531_p1), %v555_v60, %v554_v59  ;;  %v557_v0 = vld [vmem:[#allocation10 + $0x18] sm:$0xff] (%p531_p1)  ;;  %v558_v3 = vld [vmem:[#allocation10 + $0x20] sm:$0xff] (%p531_p1)  ;;  %v559_v4 = vld [vmem:[#allocation10 + $0x28] sm:$0xff] (%p531_p1) }
  0xa9   : > { %1207 = vmatprep.subr.bf16.mxu1 %v1206_v25  ;;  %1230 = vmatprep.subr.bf16.mxu0 (%p531_p1), %v1622_v62  ;;  %v1234_v2 = vpack.c.bf16 (%p531_p1), %v557_v0, %v556_v61  ;;  %v570_v10 = vld [vmem:[#allocation10 + $0x80] sm:$0xff] (%p531_p1)  ;;  %v1237_v11 = vpack.c.bf16 (%p531_p1), %v559_v4, %v558_v3  ;;  %v571_v13 = vld [vmem:[#allocation10 + $0x88] sm:$0xff] (%p531_p1)  ;;  %v572_v14 = vld [vmem:[#allocation10 + $0x90] sm:$0xff] (%p531_p1) }
  0xaa   : > { %v573_v15 = vld [vmem:[#allocation10 + $0x98] sm:$0xff] (%p531_p1)  ;;  %v560_v16 = vld [vmem:[#allocation10 + $0x30] sm:$0xff] (%p531_p1)  ;;  %v1255_v19 = vpack.c.bf16 (%p531_p1), %v571_v13, %v570_v10  ;;  %v575_v26 = vld [vmem:[#allocation10 + $0xa8] sm:$0xff] (%p531_p1) }
  0xab   : > { %1052 = vmatmul.mubr.msk.bf16.vlgmr.msra.gmra.mrb[0].mxu0 %vm356_vm1, %v1404_v22  ;;  %v561_v17 = vld [vmem:[#allocation10 + $0x38] sm:$0xff] (%p531_p1)  ;;  %v1258_v21 = vpack.c.bf16 (%p531_p1), %v573_v15, %v572_v14  ;;  %v562_v27 = vld [vmem:[#allocation10 + $0x40] sm:$0xff] (%p531_p1)  ;;  %v576_v33 = vld [vmem:[#allocation10 + $0xb0] sm:$0xff] (%p531_p1) }
  0xac   : > { %1209 = vmatpush3.bf16.msra.mxu1 %v1206_v25  ;;  %1125 = vmatprep.mubr.msk.f32.mxu0 (%p531_p1), %vm1623_vm2, %v1624_v1  ;;  %v1240_v22 = vpack.c.bf16 (%p531_p1), %v561_v17, %v560_v16  ;;  %v574_v25 = vld [vmem:[#allocation10 + $0xa0] sm:$0xff] (%p531_p1)  ;;  %v564_v35 = vld [vmem:[#allocation10 + $0x50] sm:$0xff] (%p531_p1)  ;;  %v565_v36 = vld [vmem:[#allocation10 + $0x58] sm:$0xff] (%p531_p1) }
  0xad   : > { %1211 = vmatprep.subr.bf16.mxu1 %v1210_v28  ;;  %1232 = vmatpush3.bf16.msra.mxu0 (%p531_p1), %v1231_v63  ;;  %v1261_v29 = vpack.c.bf16 (%p531_p1), %v575_v26, %v574_v25  ;;  %v1246_v38 = vpack.c.bf16 (%p531_p1), %v565_v36, %v564_v35  ;;  %v584_v61 = vld [vmem:[#allocation10 + $0xf0] sm:$0xff] (%p531_p1)  ;;  %v585_v63 = vld [vmem:[#allocation10 + $0xf8] sm:$0xff] (%p531_p1)  ;;  %v587_v3 = vld [vmem:[#allocation10 + $0x108] sm:$0xff] (%p531_p1) }
  0xae   : > { %1233 = vmatprep.subr.bf16.mxu0 (%p531_p1), %v1622_v62  ;;  %v1276_v0 = vpack.c.bf16 (%p531_p1), %v585_v63, %v584_v61  ;;  %v588_v4 = vld [vmem:[#allocation10 + $0x110] sm:$0xff] (%p531_p1)  ;;  %v594_v13 = vld [vmem:[#allocation10 + $0x140] sm:$0xff] (%p531_p1)  ;;  %v595_v14 = vld [vmem:[#allocation10 + $0x148] sm:$0xff] (%p531_p1) }
  0xaf   : > { %v1291_v15 = vpack.c.bf16 (%p531_p1), %v595_v14, %v594_v13  ;;  %v596_v16 = vld [vmem:[#allocation10 + $0x150] sm:$0xff] (%p531_p1)  ;;  %v597_v17 = vld [vmem:[#allocation10 + $0x158] sm:$0xff] (%p531_p1) }
  0xb0   : > { %1213 = vmatpush3.bf16.msra.mxu1 %v1210_v28  ;;  %v563_v28 = vld [vmem:[#allocation10 + $0x48] sm:$0xff] (%p531_p1)  ;;  %v963_v35 = vld [vmem:[#allocation10 + $0x190] ss:$0 sm:$0xff] (%p531_p1) }
  0xb1   : > { %1215 = vmatprep.subr.bf16.mxu1 %v1214_v31  ;;  %1235 = vmatpush3.bf16.msra.mxu0 (%p531_p1), %v1234_v2  ;;  %v1243_v30 = vpack.c.bf16 (%p531_p1), %v563_v28, %v562_v27  ;;  %v586_v2 = vld [vmem:[#allocation10 + $0x100] sm:$0xff] (%p531_p1)  ;;  %v600_v27 = vld [vmem:[#allocation10 + $0x170] sm:$0xff] (%p531_p1)  ;;  %v601_v28 = vld [vmem:[#allocation10 + $0x178] sm:$0xff] (%p531_p1) }
  0xb2   : > { %1236 = vmatprep.subr.bf16.mxu0 (%p531_p1), %v1622_v62 }
  0xb4   : > { %1217 = vmatpush3.bf16.msra.mxu1 %v1214_v31 }
  0xb5   : > { %1219 = vmatprep.subr.bf16.mxu1 %v1218_v34  ;;  %1238 = vmatpush3.bf16.msra.mxu0 (%p531_p1), %v1237_v11  ;;  %v593_v11 = vld [vmem:[#allocation10 + $0x138] sm:$0xff] (%p531_p1) }
  0xb6   : > { %1239 = vmatprep.subr.bf16.mxu0 (%p531_p1), %v1622_v62 }
  0xb8   : > { %1221 = vmatpush3.bf16.msra.mxu1 %v1218_v34  ;;  %v577_v34 = vld [vmem:[#allocation10 + $0xb8] sm:$0xff] (%p531_p1) }
  0xb9   : > { %1223 = vmatprep.subr.bf16.mxu1 %v1222_v37  ;;  %1241 = vmatpush3.bf16.msra.mxu0 (%p531_p1), %v1240_v22  ;;  %v961_v22 = vld [vmem:[#allocation10 + $0x180] ss:$0 sm:$0xff] (%p531_p1) }
  0xba   : > { %1242 = vmatprep.subr.bf16.mxu0 (%p531_p1), %v1622_v62 }
  0xbc   : > { %1225 = vmatpush3.bf16.msra.mxu1 %v1222_v37  ;;  %v1264_v37 = vpack.c.bf16 (%p531_p1), %v577_v34, %v576_v33 }
  0xbd   : > { %1227 = vmatprep.subr.bf16.mxu1 %v1226_v40  ;;  %1244 = vmatpush3.bf16.msra.mxu0 (%p531_p1), %v1243_v30  ;;  %v962_v30 = vld [vmem:[#allocation10 + $0x188] ss:$0 sm:$0xff] (%p531_p1) }
  0xbe   : > { %1245 = vmatprep.subr.bf16.mxu0 (%p531_p1), %v1622_v62 }
  0xc0   : > { %1229 = vmatpush3.bf16.msra.mxu1 %v1226_v40 }
  0xc1   : > { %1254 = vmatprep.subr.bf16.mxu1 (%p531_p1), %v1622_v62  ;;  %1247 = vmatpush3.bf16.msra.mxu0 (%p531_p1), %v1246_v38 }
  0xc2   : > { %1248 = vmatprep.subr.bf16.mxu0 (%p531_p1), %v1622_v62 }
 0x17e   : > { %v1053_v41 = vpop.f32.mrb[0].mxu0 }
 0x17f   : > { %v397_v42 = vpop.f32.mrb[1].mxu0 }
 0x180   : > { %v1054_v43 = vpop.f32.mrb[2].mxu0  ;;  %1087 = vmatprep.mubr.f32.mxu1 %v397_v42  ;;  %v579_v42 = vld [vmem:[#allocation10 + $0xc8] sm:$0xff] (%p531_p1) }
 0x181   : > { %v400_v44 = vpop.f32.mrb[3].mxu0 }
 0x182   : > { %1088 = vmatmul.mubr.f32.vlgmr.msra.gmra.mrb[0].mxu1 %v400_v44  ;;  %v567_v44 = vld [vmem:[#allocation10 + $0x68] sm:$0xff] (%p531_p1) }
 0x183   : > { %1090 = vmatprep.mubr.f32.mxu1 %v1053_v41  ;;  %1256 = vmatpush3.bf16.msra.mxu1 (%p531_p1), %v1255_v19  ;;  %v578_v41 = vld [vmem:[#allocation10 + $0xc0] sm:$0xff] (%p531_p1) }
 0x184   : > { %1257 = vmatprep.subr.bf16.mxu1 (%p531_p1), %v1622_v62  ;;  %v598_v19 = vld [vmem:[#allocation10 + $0x160] sm:$0xff] (%p531_p1) }
 0x186   : > { %1091 = vmatmul.mubr.f32.gmra.mrb[2].mxu1 %v1054_v43  ;;  %v566_v43 = vld [vmem:[#allocation10 + $0x60] sm:$0xff] (%p531_p1) }
 0x187   : > { %1160 = vmatprep.mubr.msk.f32.mxu1 (%p531_p1), %vm1623_vm2, %v1624_v1  ;;  %1259 = vmatpush3.bf16.msra.mxu1 (%p531_p1), %v1258_v21 }
 0x188   : > { %1260 = vmatprep.subr.bf16.mxu1 (%p531_p1), %v1622_v62 }
 0x18b   : > { %1262 = vmatpush3.bf16.msra.mxu1 (%p531_p1), %v1261_v29  ;;  %v1300_v29 = vpack.c.bf16 (%p531_p1), %v601_v28, %v600_v27 }
 0x18c   : > { %1263 = vmatprep.subr.bf16.mxu1 (%p531_p1), %v1622_v62 }
 0x18f   : > { %1265 = vmatpush3.bf16.msra.mxu1 (%p531_p1), %v1264_v37 }
 0x190   : > { %1266 = vmatprep.subr.bf16.mxu1 (%p531_p1), %v1622_v62 }
 0x255   : > { %v1089_v46 = vpop.f32.mrb[0].mxu1 }
 0x256   : > { %v507_v48 = vadd.f32 %v1089_v46, %v959_v45  ;;  %v501_v49 = vpop.f32.mrb[1].mxu1  ;;  %v1249_v46 = vpack.c.bf16 (%p531_p1), %v567_v44, %v566_v43 }
 0x257   : > { %v502_v50 = vadd.f32 %v959_v45, %v501_v49  ;;  %v580_v49 = vld [vmem:[#allocation10 + $0xd0] sm:$0xff] (%p531_p1) }
 0x258   : > { %v524_v51 = vmax.f32 %v507_v48, %v522_v47  ;;  %1250 = vmatpush3.bf16.msra.mxu0 (%p531_p1), %v1249_v46 }
 0x259   : > { %v523_v52 = vmax.f32 %v502_v50, %v522_v47  ;;  %v1092_v53 = vpop.f32.mrb[2].mxu1  ;;  %535 = sbr.rel (!%p531_p1) target bundleno = 1277 (0x4fd), region = 68  ;;  %v581_v50 = vld [vmem:[#allocation10 + $0xd8] sm:$0xff] (%p531_p1)  ;;  %1251 = vmatprep.subr.bf16.mxu0 (%p531_p1), %v1622_v62 }
 0x25a   : > { %528 = vst [vmem:[#allocation2 + $0x8] sm:$0xff] %v524_v51  ;;  %v517_v54 = vadd.f32 %v1092_v53, %v959_v45  ;;  %v511_v55 = vpop.f32.mrb[3].mxu1  ;;  %v568_v51 = vld [vmem:[#allocation10 + $0x70] sm:$0xff] (%p531_p1)  ;;  %v1270_v53 = vpack.c.bf16 (%p531_p1), %v581_v50, %v580_v49 }
 0x25b   : > { %527 = vst [vmem:[#allocation2] sm:$0xff] %v523_v52  ;;  %v512_v56 = vadd.f32 %v959_v45, %v511_v55  ;;  %v1267_v45 = vpack.c.bf16 (%p531_p1), %v579_v42, %v578_v41  ;;  %v569_v52 = vld [vmem:[#allocation10 + $0x78] sm:$0xff] (%p531_p1) }
 0x25c   : > { %v526_v57 = vmax.f32 %v517_v54, %v522_v47  ;;  %v1252_v54 = vpack.c.bf16 (%p531_p1), %v569_v52, %v568_v51 }
 0x25d   : > { %v525_v58 = vmax.f32 %v512_v56, %v522_v47  ;;  %1268 = vmatpush3.bf16.msra.mxu1 (%p531_p1), %v1267_v45 }
 0x25e   : > { %530 = vst [vmem:[#allocation2 + $0x18] sm:$0xff] %v526_v57  ;;  %1269 = vmatprep.subr.bf16.mxu1 (%p531_p1), %v1622_v62  ;;  %v582_v57 = vld [vmem:[#allocation10 + $0xe0] sm:$0xff] (%p531_p1)  ;;  %1253 = vmatpush3.bf16.msra.mxu0 (%p531_p1), %v1252_v54 }
 0x25f   : > { %529 = vst [vmem:[#allocation2 + $0x10] sm:$0xff] %v525_v58  ;;  %v583_v58 = vld [vmem:[#allocation10 + $0xe8] sm:$0xff] (%p531_p1)  ;;  %1278 = vmatprep.subr.bf16.mxu0 (%p531_p1), %v1622_v62 }
 0x260   : > { %v1273_v59 = vpack.c.bf16 %v583_v58, %v582_v57 }
 0x261   : > { %v537_v6 = vld [vmem:[#allocation2 + $0x8] sm:$0xff]  ;;  %1271 = vmatpush3.bf16.msra.mxu1 %v1270_v53 }
 0x262   : > { %v536_v5 = vld [vmem:[#allocation2] sm:$0xff]  ;;  %1272 = vmatprep.subr.bf16.mxu1 %v1622_v62 }
 0x263   : > { %v540_v9 = vadd.f32 %v537_v6, %v536_v5  ;;  %v1279_v5 = vpack.c.bf16 %v587_v3, %v586_v2  ;;  %v589_v6 = vld [vmem:[#allocation10 + $0x118] sm:$0xff] }
 0x265   : > { %v539_v8 = vld [vmem:[#allocation2 + $0x18] sm:$0xff]  ;;  %v541_v18 = vrot.slane %v540_v9, 4  ;;  %1274 = vmatpush3.bf16.msra.mxu1 %v1273_v59 }
 0x266   : > { %v538_v7 = vld [vmem:[#allocation2 + $0x10] sm:$0xff]  ;;  %1275 = vmatprep.subr.bf16.mxu1 %v1622_v62 }
 0x267   : > { %v547_v12 = vadd.f32 %v539_v8, %v538_v7  ;;  %v542_v23 = vadd.f32 %v541_v18, %v540_v9  ;;  %v1282_v7 = vpack.c.bf16 %v589_v6, %v588_v4  ;;  %v590_v8 = vld [vmem:[#allocation10 + $0x120] sm:$0xff]  ;;  %v591_v9 = vld [vmem:[#allocation10 + $0x128] sm:$0xff]  ;;  %v1294_v18 = vpack.c.bf16 %v597_v17, %v596_v16 }
 0x268   : > { %v1285_v10 = vpack.c.bf16 %v591_v9, %v590_v8 }
 0x269   : > { %v548_v20 = vrot.slane %v547_v12, 4  ;;  %v543_v31 = vrot.slane %v542_v23, 2  ;;  %1277 = vmatpush3.bf16.msra.mxu1 %v1276_v0 }
 0x26b   : > { %v549_v24 = vadd.f32 %v548_v20, %v547_v12  ;;  %v544_v39 = vadd.f32 %v543_v31, %v542_v23  ;;  %v599_v20 = vld [vmem:[#allocation10 + $0x168] sm:$0xff] }
 0x26c   : > { %v1297_v21 = vpack.c.bf16 %v599_v20, %v598_v19 }
 0x26d   : > { %v550_v32 = vrot.slane %v549_v24, 2  ;;  %v545_v47 = vrot.slane %v544_v39, 1 }
 0x26f   : > { %v551_v40 = vadd.f32 %v550_v32, %v549_v24  ;;  %v546_v55 = vadd.f32 %v545_v47, %v544_v39 }
 0x271   : > { %v552_v48 = vrot.slane %v551_v40, 1 }
 0x273   : > { %v553_v56 = vadd.f32 %v552_v48, %v551_v40 }
 0x275   : > { %v612_v60 = vsel %vm611_vm3, %v553_v56, %v546_v55 }
 0x276   : > { %1126 = vmatmul.mubr.f32.vlgmr.msra.gmra.mrb[0].mxu0 %v612_v60 }
 0x277   : > { %1195 = vmatprep.mubr.msk.f32.mxu0 %vm1623_vm2, %v1624_v1  ;;  %1280 = vmatpush3.bf16.msra.mxu0 %v1279_v5  ;;  %v592_v1 = vld [vmem:[#allocation10 + $0x130] sm:$0xff] }
 0x278   : > { %1281 = vmatprep.subr.bf16.mxu0 %v1622_v62  ;;  %v1288_v12 = vpack.c.bf16 %v593_v11, %v592_v1 }
 0x27b   : > { %1283 = vmatpush3.bf16.msra.mxu0 %v1282_v7 }
 0x27c   : > { %1284 = vmatprep.subr.bf16.mxu0 %v1622_v62 }
 0x27f   : > { %1286 = vmatpush3.bf16.msra.mxu0 %v1285_v10 }
 0x280   : > { %1287 = vmatprep.subr.bf16.mxu0 %v1622_v62 }
 0x283   : > { %1289 = vmatpush3.bf16.msra.mxu0 %v1288_v12 }
 0x284   : > { %1290 = vmatprep.subr.bf16.mxu0 %v1622_v62 }
 0x287   : > { %1292 = vmatpush3.bf16.msra.mxu0 %v1291_v15 }
 0x288   : > { %1293 = vmatprep.subr.bf16.mxu0 %v1622_v62 }
 0x28b   : > { %1295 = vmatpush3.bf16.msra.mxu0 %v1294_v18 }
 0x28c   : > { %1296 = vmatprep.subr.bf16.mxu0 %v1622_v62 }
 0x28f   : > { %1298 = vmatpush3.bf16.msra.mxu0 %v1297_v21 }
 0x290   : > { %1299 = vmatprep.subr.bf16.mxu0 %v1622_v62 }
 0x293   : > { %1301 = vmatpush3.bf16.msra.mxu0 %v1300_v29 }
 0x349   : > { %v680_v23 = vpop.f32.mrb[0].mxu0 }
 0x34a   : > { %v681_v24 = vadd.f32 %v961_v22, %v680_v23  ;;  %v1127_v25 = vpop.f32.mrb[1].mxu0 }
 0x34c   : > { %v684_v26 = vmax.f32 %v681_v24, 0.0 }
 0x34e   : > { %1161 = vmatmul.mubr.f32.vlgmr.msra.gmra.mrb[0].mxu1 %v684_v26 }
 0x421   : > { %v755_v31 = vpop.f32.mrb[0].mxu1 }
 0x422   : > { %v756_v32 = vadd.f32 %v962_v30, %v755_v31  ;;  %v1162_v33 = vpop.f32.mrb[1].mxu1 }
 0x424   : > { %v759_v34 = vmax.f32 %v756_v32, 0.0 }
 0x426   : > { %1196 = vmatmul.mubr.f32.vlgmr.msra.gmra.mrb[2].mxu0 %v759_v34 }
 0x4f9   : > { %v830_v36 = vpop.f32.mrb[2].mxu0 }
 0x4fa   : > { %v831_v62 = vadd.f32 %v963_v35, %v830_v36  ;;  %v1197_v37 = vpop.f32.mrb[3].mxu0 }
 0x4fc   : > { %835 = vst.msk [vmem:[#allocation11] sm:$0x3] %vm834_vm4, %v831_v62 }
 0x4fd PF: > { %p1341_p5 = scmp.eq.s32.totalorder %s1685_s24, 4  ;;  %s1625_s21 = smov [#allocation11]  }
 0x4fe   : > { %s843_s7 = sshll.u32 %s1625_s21, 4  ;;  %s844_s7 = int_to_ptr.vmem [resolvable:$true] %s843_s7 }
 0x4ff   : > { %s1519_s18 = scalar_lea.vmem %s844_s7, 32  ;;  %p1526_p9 = scmp.lt.s32.totalorder %s844_s7, %s844_s7 }
 0x500   : > { %p1520_p13 = scmp.ne.s32.totalorder %s844_s7, %s1519_s18  ;;  %p1527_p11 = scmp.lt.s32.totalorder %s1519_s18, %s1519_s18 }
 0x502   : > { %p1521_p2 = pnand %p1520_p13, %p1341_p5  ;;  %p1528_p12 = por %p1527_p11, %p1526_p9 }
 0x504   : > { %p1522_p6 = pneg %p1521_p2 }
 0x506   : > { %p1529_p0 = pnand %p1528_p12, %p1522_p6 }
 0x508   : > { %1532 = shalt.err (!%p1529_p0)
}
 0x509   : > { %s1533_s14 = scalar_lea.hbm %s1969_s5, 32 }
 0x50a   : > { %p1534_p3 = scmp.ne.s32.totalorder %s1969_s5, %s1533_s14  ;;  %p1539_p8 = scmp.lt.u32.totalorder %s1533_s14, %s1969_s5 }
 0x50c   : > { %p1535_p7 = pnand %p1534_p3, %p1341_p5 }
 0x50e   : > { %p1536_p10 = pneg %p1535_p7 }
 0x510   : > { %p1541_p1 = pnand %p1539_p8, %p1536_p10 }
 0x512   : > { %1544 = shalt.err (!%p1541_p1)
}
 0x513   : > { %1317 = dma.vmem_to_hbm [thread:$0]  (%p1341_p5), %s844_s7, 32, %s1969_s5, [#allocation6]  }
 0x514   : > { %1586 = dma.done.wait (%p1341_p5), [#allocation6], 32  }
 0x515   : > { %1588 = vsyncadd (%p1341_p5), [#allocation6], 4294967264 }
 0x516 PF: > { %s18_s23 = sadd.s32 1, %s1611_s23   ;;  %s1992_s18 = smov %s1595_s19 }
 0x517   : > { %p15_p4 = scmp.ge.s32.totalorder %s18_s23, 7   ;;  %s1993_s19 = smov %s1599_s20 }
 0x518   : > { %s1994_s20 = smov %s1799_s17  ;;  %s1995_s21 = smov %s1607_s22 }
 0x519   : > { %s1996_s22 = smov %s1998_s8  ;;  %17 = sbr.rel (!%p15_p4) target bundleno = 7 (0x7), region = 103 }
 0x520   :  { %856 = vsyncpa [#allocation5], 1 }
 0x521   :  { %858 = vsyncpa [#allocation5 + $0x1], 1 }
 0x522   :  { %859 = vsyncpa [#allocation8], 1 }
 0x523   :  { %860 = vsyncpa [#allocation6], 1 }
 0x524   :  { %862 = vsyncpa [#allocation6 + $0x1], 1 }

</bundles_post_ra>
